<compile_context>
chip_gen: v7x
topology: tpu7x:2x2x1
jax: 0.10.0
libtpu: 0.0.40
codegen_flags: <defaults>
</compile_context>

<pallas_src>
import functools

import jax
import jax.numpy as jnp
from jax.experimental import pallas as pl
from jax.experimental.pallas import tpu as pltpu

BN_EPS = 1e-5                     # torch.nn.BatchNorm1d default (training mode stats)
MXU_DTYPE = jnp.bfloat16          # matmul operand dtype; accumulation stays f32
_VMEM = pltpu.MemorySpace.VMEM


# ---------------------------------------------------------------------------
# pallas_call helper: grid-less, every operand a whole-array VMEM ref.
# ---------------------------------------------------------------------------
def _vmem_call(kernel, args, out_shapes):
    return pl.pallas_call(
        kernel,
        out_shape=tuple(jax.ShapeDtypeStruct(s, jnp.float32) for s in out_shapes),
        in_specs=[pl.BlockSpec(memory_space=_VMEM) for _ in args],
        out_specs=tuple(pl.BlockSpec(memory_space=_VMEM) for _ in out_shapes),
    )(*args)


# ---------------------------------------------------------------------------
# In-kernel math helpers
# ---------------------------------------------------------------------------
def _mdot(a, b):
    # MXU matmul: bf16 operands, f32 accumulation.
    return jnp.dot(a.astype(MXU_DTYPE), b.astype(MXU_DTYPE),
                   preferred_element_type=jnp.float32)


def _bn(x, gamma, beta):
    # BatchNorm1d, batch statistics (training mode), eps = torch default.
    mean = jnp.mean(x, axis=0, keepdims=True)
    var = jnp.mean(jnp.square(x - mean), axis=0, keepdims=True)
    return (x - mean) * jax.lax.rsqrt(var + BN_EPS) * gamma + beta


def _relu(x):
    return jnp.maximum(x, 0.0)


def _mlp2(x, w1, b1, g1, be1, w2, b2, g2, be2):
    # MLP([d_in, d_mid, d_out]) as built by the reference:
    #   Linear -> BN -> ReLU -> Linear -> BN   (trailing ReLU stripped by [:-1])
    h = _relu(_bn(_mdot(x, w1) + b1, g1, be1))
    return _bn(_mdot(h, w2) + b2, g2, be2)


# ---------------------------------------------------------------------------
# Fused kernels
# ---------------------------------------------------------------------------
def _encoder_kernel(emb_ref, bng_ref, bnb_ref,
                    pos_ref, aco_ref, posw_ref, posb_ref,
                    tw1_ref, tb1_ref, tg1_ref, tbe1_ref,
                    tw2_ref, tb2_ref, tg2_ref, tbe2_ref,
                    pert_ref, asim_ref, simw_ref, simb_ref,
                    base_out_ref, pge_out_ref,
                    *, num_graphs, num_genes, n_pos_layers, n_sim_layers):
    # gene embedding -> bn_emb (batch stats) -> ReLU
    base = _relu(_bn(emb_ref[...], bng_ref[...], bnb_ref[...]))

    # Co-expression SGConv stack.  The same (G,G) normalized adjacency applies to
    # every graph: block-diagonal propagation done per graph (static unroll).
    a_co = aco_ref[...]
    pos = pos_ref[...]
    for layer in range(n_pos_layers):
        parts = []
        for b in range(num_graphs):
            xb = pos[b * num_genes:(b + 1) * num_genes, :]      # (G, H)
            parts.append(_mdot(a_co, xb))
        px = parts[0] if num_graphs == 1 else jnp.concatenate(parts, axis=0)
        pos = _mdot(px, posw_ref[layer]) + posb_ref[layer]
        if layer < n_pos_layers - 1:
            pos = _relu(pos)

    base = base + 0.2 * pos
    base = _mlp2(base,
                 tw1_ref[...], tb1_ref[...], tg1_ref[...], tbe1_ref[...],
                 tw2_ref[...], tb2_ref[...], tg2_ref[...], tbe2_ref[...])
    base_out_ref[...] = base

    # GO-similarity SGConv stack over the perturbation embedding table.
    a_sim = asim_ref[...]
    pge = pert_ref[...]
    for layer in range(n_sim_layers):
        pge = _mdot(_mdot(a_sim, pge), simw_ref[layer]) + simb_ref[layer]
        if layer < n_sim_layers - 1:
            pge = _relu(pge)
    pge_out_ref[...] = pge


def _mlp2_kernel(x_ref, w1_ref, b1_ref, g1_ref, be1_ref,
                 w2_ref, b2_ref, g2_ref, be2_ref, out_ref):
    out_ref[...] = _mlp2(x_ref[...],
                         w1_ref[...], b1_ref[...], g1_ref[...], be1_ref[...],
                         w2_ref[...], b2_ref[...], g2_ref[...], be2_ref[...])


def _recovery_kernel(base_ref, bng_ref, bnb_ref,
                     w1_ref, b1_ref, g1_ref, be1_ref,
                     w2_ref, b2_ref, g2_ref, be2_ref, out_ref):
    # bn_pert_base -> ReLU (transform) -> recovery_w MLP (H -> 2H -> H), fused.
    base = _relu(_bn(base_ref[...], bng_ref[...], bnb_ref[...]))
    out_ref[...] = _mlp2(base,
                         w1_ref[...], b1_ref[...], g1_ref[...], be1_ref[...],
                         w2_ref[...], b2_ref[...], g2_ref[...], be2_ref[...])


def _decode_kernel(rec_ref, w1_ref, b1_ref,
                   cw1_ref, cb1_ref, cg1_ref, cbe1_ref,
                   cw2_ref, cb2_ref, cg2_ref, cbe2_ref,
                   w2c0_ref, w2rT_ref, b2_ref, xres_ref, out_ref):
    # Gene-specific decoder 1:
    #   out1[b,g] = sum_h rec[b,g,h] * indv_w1[g,h] + indv_b1[g]
    rec = rec_ref[...]                                           # (B, G, H)
    out1 = jnp.sum(rec * w1_ref[...][None, :, :], axis=2) + b1_ref[...]   # (B, G)
    # cross_gene_state MLP over the gene axis: (B, G) -> (B, H)
    cge = _mlp2(out1,
                cw1_ref[...], cb1_ref[...], cg1_ref[...], cbe1_ref[...],
                cw2_ref[...], cb2_ref[...], cg2_ref[...], cbe2_ref[...])
    # Gene-specific decoder 2 + residual expression:
    #   out[b,g] = out1[b,g]*w2[g,0] + sum_h cge[b,h]*w2[g,1+h] + b2[g] + x[b,g]
    out_ref[...] = (out1 * w2c0_ref[...] + _mdot(cge, w2rT_ref[...])
                    + b2_ref[...] + xres_ref[...])


# ---------------------------------------------------------------------------
# Kernel wrappers
# ---------------------------------------------------------------------------
def encoder_op(emb, pos, params, num_graphs, num_genes):
    n_pos = params['pos_w'].shape[0]
    n_sim = params['sim_w'].shape[0]
    t = params['emb_trans_v2']
    k = functools.partial(_encoder_kernel, num_graphs=num_graphs,
                          num_genes=num_genes, n_pos_layers=n_pos,
                          n_sim_layers=n_sim)
    args = [emb, params['bn_emb_g'], params['bn_emb_b'],
            pos, params['A_coexpress'], params['pos_w'], params['pos_b'],
            t['w1'], t['b1'], t['g1'], t['be1'],
            t['w2'], t['b2'], t['g2'], t['be2'],
            params['pert_emb'], params['A_sim'],
            params['sim_w'], params['sim_b']]
    hidden = emb.shape[1]
    base, pge = _vmem_call(k, args,
                           [(emb.shape[0], hidden),
                            (params['pert_emb'].shape[0], hidden)])
    return base, pge


def mlp2_op(x, p):
    args = [x, p['w1'], p['b1'], p['g1'], p['be1'],
            p['w2'], p['b2'], p['g2'], p['be2']]
    (y,) = _vmem_call(_mlp2_kernel, args, [(x.shape[0], p['w2'].shape[1])])
    return y


def recovery_op(base_flat, params):
    r = params['recovery_w']
    args = [base_flat, params['bn_pert_base_g'], params['bn_pert_base_b'],
            r['w1'], r['b1'], r['g1'], r['be1'],
            r['w2'], r['b2'], r['g2'], r['be2']]
    (rec,) = _vmem_call(_recovery_kernel, args,
                        [(base_flat.shape[0], r['w2'].shape[1])])
    return rec


def decode_op(rec3, params, x_res):
    c = params['cross_gene_state']
    args = [rec3, params['indv_w1'], params['indv_b1'],
            c['w1'], c['b1'], c['g1'], c['be1'],
            c['w2'], c['b2'], c['g2'], c['be2'],
            params['indv_w2_col0'], params['indv_w2_rest_T'],
            params['indv_b2'], x_res]
    (out,) = _vmem_call(_decode_kernel, args, [x_res.shape])
    return out


# ---------------------------------------------------------------------------
# Parameter / graph construction (deterministic, in-script)
# ---------------------------------------------------------------------------
def dense_gcn_norm(edge_src, edge_dst, edge_w, num_nodes):
    """Dense equivalent of torch_geometric gcn_norm with added self-loops."""
    a = jnp.zeros((num_nodes, num_nodes), jnp.float32)
    a = a.at[edge_dst, edge_src].add(edge_w)          # A[dst, src] = w
    a = a + jnp.eye(num_nodes, dtype=jnp.float32)     # self loops, fill_value=1
    deg = jnp.sum(a, axis=1)
    dis = jax.lax.rsqrt(jnp.maximum(deg, 1e-12))
    return dis[:, None] * a * dis[None, :]            # D^-1/2 (A+I) D^-1/2


def ring_edges(n):
    src = jnp.arange(n, dtype=jnp.int32)
    dst = (src + 1) % n
    return jnp.concatenate([src, dst]), jnp.concatenate([dst, src])


def renorm_rows(w, max_norm=1.0):
    # nn.Embedding(max_norm=True): rows renormed to norm <= 1 when accessed.
    n = jnp.linalg.norm(w, axis=1, keepdims=True)
    return w * jnp.minimum(1.0, max_norm / jnp.maximum(n, 1e-7))


def init_params(key, num_genes, num_perts, hidden,
                num_gene_gnn_layers, num_go_gnn_layers):
    keys = iter(jax.random.split(key, 128))

    def nrm(shape, scale=0.1):
        return scale * jax.random.normal(next(keys), shape, jnp.float32)

    def mlp_params(d_in, d_mid, d_out):
        return dict(w1=nrm((d_in, d_mid)), b1=nrm((1, d_mid)),
                    g1=jnp.ones((1, d_mid), jnp.float32),
                    be1=jnp.zeros((1, d_mid), jnp.float32),
                    w2=nrm((d_mid, d_out)), b2=nrm((1, d_out)),
                    g2=jnp.ones((1, d_out), jnp.float32),
                    be2=jnp.zeros((1, d_out), jnp.float32))

    p = {}
    p['gene_emb'] = renorm_rows(nrm((num_genes, hidden), 1.0))
    p['emb_pos'] = renorm_rows(nrm((num_genes, hidden), 1.0))
    p['pert_emb'] = renorm_rows(nrm((num_perts, hidden), 1.0))

    p['bn_emb_g'] = jnp.ones((1, hidden), jnp.float32)
    p['bn_emb_b'] = jnp.zeros((1, hidden), jnp.float32)
    p['bn_pert_base_g'] = jnp.ones((1, hidden), jnp.float32)
    p['bn_pert_base_b'] = jnp.zeros((1, hidden), jnp.float32)

    p['emb_trans_v2'] = mlp_params(hidden, hidden, hidden)
    p['pert_fuse'] = mlp_params(hidden, hidden, hidden)
    p['recovery_w'] = mlp_params(hidden, 2 * hidden, hidden)
    p['cross_gene_state'] = mlp_params(num_genes, hidden, hidden)

    # SGConv layer weights, stacked (L, H, H) / (L, 1, H) so a single kernel
    # unrolls over them with static indices.
    p['pos_w'] = nrm((num_gene_gnn_layers, hidden, hidden))
    p['pos_b'] = nrm((num_gene_gnn_layers, 1, hidden))
    p['sim_w'] = nrm((num_go_gnn_layers, hidden, hidden))
    p['sim_b'] = nrm((num_go_gnn_layers, 1, hidden))

    p['indv_w1'] = nrm((num_genes, hidden))          # torch shape (G, H, 1)
    p['indv_b1'] = nrm((1, num_genes))               # torch shape (G, 1)
    indv_w2 = nrm((num_genes, hidden + 1))           # torch shape (1, G, H+1)
    p['indv_w2_col0'] = indv_w2[:, 0].reshape(1, num_genes)
    p['indv_w2_rest_T'] = indv_w2[:, 1:].T           # (H, G)
    p['indv_b2'] = nrm((1, num_genes))               # torch shape (1, G)

    # Synthetic co-expression / GO-similarity rings (weight 0.5).  A_coexpress
    # is a per-graph (G, G) matrix: the same graph is replicated per batch
    # element, so propagation is block-diagonal and done per graph in-kernel.
    gs, gd = ring_edges(num_genes)
    p['A_coexpress'] = dense_gcn_norm(gs, gd, jnp.full(gs.shape, 0.5, jnp.float32),
                                      num_genes)
    ps_, pd_ = ring_edges(num_perts)
    p['A_sim'] = dense_gcn_norm(ps_, pd_, jnp.full(ps_.shape, 0.5, jnp.float32),
                                num_perts)
    return p


# ---------------------------------------------------------------------------
# GEARS forward pass
# ---------------------------------------------------------------------------
def gears_forward(params, x, pert_idx, num_graphs, num_genes, hidden,
                  no_perturb=False):
    if no_perturb:
        return x.reshape(num_graphs, num_genes)

    gene_ids = jnp.tile(jnp.arange(num_genes), num_graphs)
    emb = params['gene_emb'][gene_ids]                 # (N, H) row gather (JAX glue)
    pos = params['emb_pos'][gene_ids]                  # (N, H)

    # Fused encoder: bn_emb+ReLU, co-expression SGConv stack (block-diagonal),
    # +0.2*pos, emb_trans_v2 MLP, and GO-similarity SGConv stack.
    base_emb, pge = encoder_op(emb, pos, params, num_graphs, num_genes)

    base_emb = base_emb.reshape(num_graphs, num_genes, hidden)

    # Data-dependent perturbation bookkeeping (static python structure -> glue).
    pert_index = []
    for gi, plist in enumerate(pert_idx):
        for j in plist:
            if j != -1:
                pert_index.append((gi, j))
    if len(pert_index) > 0:
        pert_track = {}
        for gi, pj in pert_index:
            if gi in pert_track:
                pert_track[gi] = pert_track[gi] + pge[pj]
            else:
                pert_track[gi] = pge[pj]
        vals = list(pert_track.values())
        if len(vals) == 1:
            emb_total = mlp2_op(jnp.stack(vals * 2), params['pert_fuse'])
        else:
            emb_total = mlp2_op(jnp.stack(vals), params['pert_fuse'])
        for i, key in enumerate(pert_track.keys()):
            base_emb = base_emb.at[key].add(emb_total[i][None, :])

    base_flat = base_emb.reshape(num_graphs * num_genes, hidden)

    # Fused bn_pert_base + ReLU + recovery_w MLP.
    rec = recovery_op(base_flat, params)
    rec3 = rec.reshape(num_graphs, num_genes, hidden)   # free XLA reshape

    # Fused decode1 + cross_gene_state MLP + decode2 + residual expression.
    final = decode_op(rec3, params, x.reshape(num_graphs, num_genes))
    # TODO(synk): uncertainty head (uncertainty_w MLP) not exercised; args['uncertainty']=False.
    return final


# ---------------------------------------------------------------------------
if __name__ == "__main__":
    NUM_GENES = 16
    NUM_PERTS = 8
    HIDDEN = 32
    NUM_GRAPHS = 2
    NUM_GENE_GNN_LAYERS = 1
    NUM_GO_GNN_LAYERS = 1

    key = jax.random.PRNGKey(0)
    k_param, k_x = jax.random.split(key)
    params = init_params(k_param, NUM_GENES, NUM_PERTS, HIDDEN,
                         NUM_GENE_GNN_LAYERS, NUM_GO_GNN_LAYERS)

    # data.x : (num_graphs * num_genes, 1) expression values
    x = jax.random.normal(k_x, (NUM_GRAPHS * NUM_GENES, 1), jnp.float32)
    # data.pert_idx : per-graph perturbation ids (-1 = none)
    pert_idx = [[1, -1], [3, 0]]

    out = gears_forward(params, x, pert_idx, NUM_GRAPHS, NUM_GENES, HIDDEN,
                        no_perturb=False)
    out = jax.block_until_ready(out)

    assert out.shape == (NUM_GRAPHS, NUM_GENES), out.shape
    assert bool(jnp.all(jnp.isfinite(out)))
    print("KERNEL_OK")
</pallas_src>

<mosaic_0001>
module attributes {stable_mosaic.version = 11 : i64} {
  func.func @_encoder_kernel(%arg0: memref<32x32xf32, #tpu.memory_space<vmem>>, %arg1: memref<1x32xf32, #tpu.memory_space<vmem>>, %arg2: memref<1x32xf32, #tpu.memory_space<vmem>>, %arg3: memref<32x32xf32, #tpu.memory_space<vmem>>, %arg4: memref<16x16xf32, #tpu.memory_space<vmem>>, %arg5: memref<1x32x32xf32, #tpu.memory_space<vmem>>, %arg6: memref<1x1x32xf32, #tpu.memory_space<vmem>>, %arg7: memref<32x32xf32, #tpu.memory_space<vmem>>, %arg8: memref<1x32xf32, #tpu.memory_space<vmem>>, %arg9: memref<1x32xf32, #tpu.memory_space<vmem>>, %arg10: memref<1x32xf32, #tpu.memory_space<vmem>>, %arg11: memref<32x32xf32, #tpu.memory_space<vmem>>, %arg12: memref<1x32xf32, #tpu.memory_space<vmem>>, %arg13: memref<1x32xf32, #tpu.memory_space<vmem>>, %arg14: memref<1x32xf32, #tpu.memory_space<vmem>>, %arg15: memref<8x32xf32, #tpu.memory_space<vmem>>, %arg16: memref<8x8xf32, #tpu.memory_space<vmem>>, %arg17: memref<1x32x32xf32, #tpu.memory_space<vmem>>, %arg18: memref<1x1x32xf32, #tpu.memory_space<vmem>>, %arg19: memref<32x32xf32, #tpu.memory_space<vmem>>, %arg20: memref<8x32xf32, #tpu.memory_space<vmem>>) attributes {dimension_semantics = [], scalar_prefetch = 0 : i64, scratch_operands = 0 : i64, tpu.core_type = #tpu.core_type<tc>} {
    %c0 = arith.constant 0 : index
    %c0_0 = arith.constant 0 : index
    %0 = vector.load %arg0[%c0, %c0_0] : memref<32x32xf32, #tpu.memory_space<vmem>>, vector<32x32xf32>
    %c0_1 = arith.constant 0 : index
    %c0_2 = arith.constant 0 : index
    %1 = vector.load %arg1[%c0_1, %c0_2] : memref<1x32xf32, #tpu.memory_space<vmem>>, vector<1x32xf32>
    %c0_3 = arith.constant 0 : index
    %c0_4 = arith.constant 0 : index
    %2 = vector.load %arg2[%c0_3, %c0_4] : memref<1x32xf32, #tpu.memory_space<vmem>>, vector<1x32xf32>
    %cst = arith.constant dense<0.000000e+00> : vector<32xf32>
    %3 = vector.multi_reduction <add>, %0, %cst [0] : vector<32x32xf32> to vector<32xf32>
    %4 = vector.shape_cast %3 : vector<32xf32> to vector<1x32xf32>
    %cst_5 = arith.constant 3.200000e+01 : f32
    %5 = vector.broadcast %cst_5 : f32 to vector<1x32xf32>
    %6 = arith.divf %4, %5 : vector<1x32xf32>
    %7 = vector.broadcast %6 : vector<1x32xf32> to vector<32x32xf32>
    %8 = arith.subf %0, %7 : vector<32x32xf32>
    %9 = arith.mulf %8, %8 : vector<32x32xf32>
    %cst_6 = arith.constant dense<0.000000e+00> : vector<32xf32>
    %10 = vector.multi_reduction <add>, %9, %cst_6 [0] : vector<32x32xf32> to vector<32xf32>
    %11 = vector.shape_cast %10 : vector<32xf32> to vector<1x32xf32>
    %cst_7 = arith.constant 3.200000e+01 : f32
    %12 = vector.broadcast %cst_7 : f32 to vector<1x32xf32>
    %13 = arith.divf %11, %12 : vector<1x32xf32>
    %14 = vector.broadcast %6 : vector<1x32xf32> to vector<32x32xf32>
    %15 = arith.subf %0, %14 : vector<32x32xf32>
    %cst_8 = arith.constant 9.99999974E-6 : f32
    %16 = vector.broadcast %cst_8 : f32 to vector<1x32xf32>
    %17 = arith.addf %13, %16 : vector<1x32xf32>
    %18 = math.rsqrt %17 : vector<1x32xf32>
    %19 = vector.broadcast %18 : vector<1x32xf32> to vector<32x32xf32>
    %20 = arith.mulf %15, %19 : vector<32x32xf32>
    %21 = vector.broadcast %1 : vector<1x32xf32> to vector<32x32xf32>
    %22 = arith.mulf %20, %21 : vector<32x32xf32>
    %23 = vector.broadcast %2 : vector<1x32xf32> to vector<32x32xf32>
    %24 = arith.addf %22, %23 : vector<32x32xf32>
    %cst_9 = arith.constant 0.000000e+00 : f32
    %25 = vector.broadcast %cst_9 : f32 to vector<32x32xf32>
    %26 = arith.maximumf %24, %25 : vector<32x32xf32>
    %c0_10 = arith.constant 0 : index
    %c0_11 = arith.constant 0 : index
    %27 = vector.load %arg4[%c0_10, %c0_11] : memref<16x16xf32, #tpu.memory_space<vmem>>, vector<16x16xf32>
    %c0_12 = arith.constant 0 : index
    %c0_13 = arith.constant 0 : index
    %28 = vector.load %arg3[%c0_12, %c0_13] : memref<32x32xf32, #tpu.memory_space<vmem>>, vector<32x32xf32>
    %29 = vector.extract_strided_slice %28 {offsets = [0, 0], sizes = [16, 32], strides = [1, 1]} : vector<32x32xf32> to vector<16x32xf32>
    %30 = arith.truncf %27 : vector<16x16xf32> to vector<16x16xbf16>
    %31 = arith.truncf %29 : vector<16x32xf32> to vector<16x32xbf16>
    %cst_14 = arith.constant dense<0.000000e+00> : vector<16x32xf32>
    %32 = tpu.matmul %30, %31, %cst_14 {dimension_numbers = #tpu.dot_dimension_numbers<[1], [0], [0], [1], [0, 0, 1, 1], [], []>} : vector<16x16xbf16>, vector<16x32xbf16>, vector<16x32xf32> -> vector<16x32xf32>
    %33 = vector.extract_strided_slice %28 {offsets = [16, 0], sizes = [16, 32], strides = [1, 1]} : vector<32x32xf32> to vector<16x32xf32>
    %34 = arith.truncf %27 : vector<16x16xf32> to vector<16x16xbf16>
    %35 = arith.truncf %33 : vector<16x32xf32> to vector<16x32xbf16>
    %cst_15 = arith.constant dense<0.000000e+00> : vector<16x32xf32>
    %36 = tpu.matmul %34, %35, %cst_15 {dimension_numbers = #tpu.dot_dimension_numbers<[1], [0], [0], [1], [0, 0, 1, 1], [], []>} : vector<16x16xbf16>, vector<16x32xbf16>, vector<16x32xf32> -> vector<16x32xf32>
    %37 = tpu.concatenate %32, %36 in 0 : vector<16x32xf32>, vector<16x32xf32> -> vector<32x32xf32>
    %c0_16 = arith.constant 0 : index
    %c0_17 = arith.constant 0 : index
    %c0_18 = arith.constant 0 : index
    %38 = vector.load %arg5[%c0_16, %c0_17, %c0_18] : memref<1x32x32xf32, #tpu.memory_space<vmem>>, vector<1x32x32xf32>
    %39 = vector.shape_cast %38 : vector<1x32x32xf32> to vector<32x32xf32>
    %40 = arith.truncf %37 : vector<32x32xf32> to vector<32x32xbf16>
    %41 = arith.truncf %39 : vector<32x32xf32> to vector<32x32xbf16>
    %cst_19 = arith.constant dense<0.000000e+00> : vector<32x32xf32>
    %42 = tpu.matmul %40, %41, %cst_19 {dimension_numbers = #tpu.dot_dimension_numbers<[1], [0], [0], [1], [0, 0, 1, 1], [], []>} : vector<32x32xbf16>, vector<32x32xbf16>, vector<32x32xf32> -> vector<32x32xf32>
    %c0_20 = arith.constant 0 : index
    %c0_21 = arith.constant 0 : index
    %c0_22 = arith.constant 0 : index
    %43 = vector.load %arg6[%c0_20, %c0_21, %c0_22] : memref<1x1x32xf32, #tpu.memory_space<vmem>>, vector<1x1x32xf32>
    %44 = vector.shape_cast %43 : vector<1x1x32xf32> to vector<1x32xf32>
    %45 = vector.broadcast %44 : vector<1x32xf32> to vector<32x32xf32>
    %46 = arith.addf %42, %45 : vector<32x32xf32>
    %cst_23 = arith.constant 2.000000e-01 : f32
    %47 = vector.broadcast %cst_23 : f32 to vector<32x32xf32>
    %48 = arith.mulf %47, %46 : vector<32x32xf32>
    %49 = arith.addf %26, %48 : vector<32x32xf32>
    %c0_24 = arith.constant 0 : index
    %c0_25 = arith.constant 0 : index
    %50 = vector.load %arg7[%c0_24, %c0_25] : memref<32x32xf32, #tpu.memory_space<vmem>>, vector<32x32xf32>
    %c0_26 = arith.constant 0 : index
    %c0_27 = arith.constant 0 : index
    %51 = vector.load %arg8[%c0_26, %c0_27] : memref<1x32xf32, #tpu.memory_space<vmem>>, vector<1x32xf32>
    %c0_28 = arith.constant 0 : index
    %c0_29 = arith.constant 0 : index
    %52 = vector.load %arg9[%c0_28, %c0_29] : memref<1x32xf32, #tpu.memory_space<vmem>>, vector<1x32xf32>
    %c0_30 = arith.constant 0 : index
    %c0_31 = arith.constant 0 : index
    %53 = vector.load %arg10[%c0_30, %c0_31] : memref<1x32xf32, #tpu.memory_space<vmem>>, vector<1x32xf32>
    %c0_32 = arith.constant 0 : index
    %c0_33 = arith.constant 0 : index
    %54 = vector.load %arg11[%c0_32, %c0_33] : memref<32x32xf32, #tpu.memory_space<vmem>>, vector<32x32xf32>
    %c0_34 = arith.constant 0 : index
    %c0_35 = arith.constant 0 : index
    %55 = vector.load %arg12[%c0_34, %c0_35] : memref<1x32xf32, #tpu.memory_space<vmem>>, vector<1x32xf32>
    %c0_36 = arith.constant 0 : index
    %c0_37 = arith.constant 0 : index
    %56 = vector.load %arg13[%c0_36, %c0_37] : memref<1x32xf32, #tpu.memory_space<vmem>>, vector<1x32xf32>
    %c0_38 = arith.constant 0 : index
    %c0_39 = arith.constant 0 : index
    %57 = vector.load %arg14[%c0_38, %c0_39] : memref<1x32xf32, #tpu.memory_space<vmem>>, vector<1x32xf32>
    %58 = arith.truncf %49 : vector<32x32xf32> to vector<32x32xbf16>
    %59 = arith.truncf %50 : vector<32x32xf32> to vector<32x32xbf16>
    %cst_40 = arith.constant dense<0.000000e+00> : vector<32x32xf32>
    %60 = tpu.matmul %58, %59, %cst_40 {dimension_numbers = #tpu.dot_dimension_numbers<[1], [0], [0], [1], [0, 0, 1, 1], [], []>} : vector<32x32xbf16>, vector<32x32xbf16>, vector<32x32xf32> -> vector<32x32xf32>
    %61 = vector.broadcast %51 : vector<1x32xf32> to vector<32x32xf32>
    %62 = arith.addf %60, %61 : vector<32x32xf32>
    %cst_41 = arith.constant dense<0.000000e+00> : vector<32xf32>
    %63 = vector.multi_reduction <add>, %62, %cst_41 [0] : vector<32x32xf32> to vector<32xf32>
    %64 = vector.shape_cast %63 : vector<32xf32> to vector<1x32xf32>
    %cst_42 = arith.constant 3.200000e+01 : f32
    %65 = vector.broadcast %cst_42 : f32 to vector<1x32xf32>
    %66 = arith.divf %64, %65 : vector<1x32xf32>
    %67 = vector.broadcast %66 : vector<1x32xf32> to vector<32x32xf32>
    %68 = arith.subf %62, %67 : vector<32x32xf32>
    %69 = arith.mulf %68, %68 : vector<32x32xf32>
    %cst_43 = arith.constant dense<0.000000e+00> : vector<32xf32>
    %70 = vector.multi_reduction <add>, %69, %cst_43 [0] : vector<32x32xf32> to vector<32xf32>
    %71 = vector.shape_cast %70 : vector<32xf32> to vector<1x32xf32>
    %cst_44 = arith.constant 3.200000e+01 : f32
    %72 = vector.broadcast %cst_44 : f32 to vector<1x32xf32>
    %73 = arith.divf %71, %72 : vector<1x32xf32>
    %74 = vector.broadcast %66 : vector<1x32xf32> to vector<32x32xf32>
    %75 = arith.subf %62, %74 : vector<32x32xf32>
    %cst_45 = arith.constant 9.99999974E-6 : f32
    %76 = vector.broadcast %cst_45 : f32 to vector<1x32xf32>
    %77 = arith.addf %73, %76 : vector<1x32xf32>
    %78 = math.rsqrt %77 : vector<1x32xf32>
    %79 = vector.broadcast %78 : vector<1x32xf32> to vector<32x32xf32>
    %80 = arith.mulf %75, %79 : vector<32x32xf32>
    %81 = vector.broadcast %52 : vector<1x32xf32> to vector<32x32xf32>
    %82 = arith.mulf %80, %81 : vector<32x32xf32>
    %83 = vector.broadcast %53 : vector<1x32xf32> to vector<32x32xf32>
    %84 = arith.addf %82, %83 : vector<32x32xf32>
    %cst_46 = arith.constant 0.000000e+00 : f32
    %85 = vector.broadcast %cst_46 : f32 to vector<32x32xf32>
    %86 = arith.maximumf %84, %85 : vector<32x32xf32>
    %87 = arith.truncf %86 : vector<32x32xf32> to vector<32x32xbf16>
    %88 = arith.truncf %54 : vector<32x32xf32> to vector<32x32xbf16>
    %cst_47 = arith.constant dense<0.000000e+00> : vector<32x32xf32>
    %89 = tpu.matmul %87, %88, %cst_47 {dimension_numbers = #tpu.dot_dimension_numbers<[1], [0], [0], [1], [0, 0, 1, 1], [], []>} : vector<32x32xbf16>, vector<32x32xbf16>, vector<32x32xf32> -> vector<32x32xf32>
    %90 = vector.broadcast %55 : vector<1x32xf32> to vector<32x32xf32>
    %91 = arith.addf %89, %90 : vector<32x32xf32>
    %cst_48 = arith.constant dense<0.000000e+00> : vector<32xf32>
    %92 = vector.multi_reduction <add>, %91, %cst_48 [0] : vector<32x32xf32> to vector<32xf32>
    %93 = vector.shape_cast %92 : vector<32xf32> to vector<1x32xf32>
    %cst_49 = arith.constant 3.200000e+01 : f32
    %94 = vector.broadcast %cst_49 : f32 to vector<1x32xf32>
    %95 = arith.divf %93, %94 : vector<1x32xf32>
    %96 = vector.broadcast %95 : vector<1x32xf32> to vector<32x32xf32>
    %97 = arith.subf %91, %96 : vector<32x32xf32>
    %98 = arith.mulf %97, %97 : vector<32x32xf32>
    %cst_50 = arith.constant dense<0.000000e+00> : vector<32xf32>
    %99 = vector.multi_reduction <add>, %98, %cst_50 [0] : vector<32x32xf32> to vector<32xf32>
    %100 = vector.shape_cast %99 : vector<32xf32> to vector<1x32xf32>
    %cst_51 = arith.constant 3.200000e+01 : f32
    %101 = vector.broadcast %cst_51 : f32 to vector<1x32xf32>
    %102 = arith.divf %100, %101 : vector<1x32xf32>
    %103 = vector.broadcast %95 : vector<1x32xf32> to vector<32x32xf32>
    %104 = arith.subf %91, %103 : vector<32x32xf32>
    %cst_52 = arith.constant 9.99999974E-6 : f32
    %105 = vector.broadcast %cst_52 : f32 to vector<1x32xf32>
    %106 = arith.addf %102, %105 : vector<1x32xf32>
    %107 = math.rsqrt %106 : vector<1x32xf32>
    %108 = vector.broadcast %107 : vector<1x32xf32> to vector<32x32xf32>
    %109 = arith.mulf %104, %108 : vector<32x32xf32>
    %110 = vector.broadcast %56 : vector<1x32xf32> to vector<32x32xf32>
    %111 = arith.mulf %109, %110 : vector<32x32xf32>
    %112 = vector.broadcast %57 : vector<1x32xf32> to vector<32x32xf32>
    %113 = arith.addf %111, %112 : vector<32x32xf32>
    %c0_53 = arith.constant 0 : index
    %c0_54 = arith.constant 0 : index
    %114 = vector.load %arg19[%c0_53, %c0_54] : memref<32x32xf32, #tpu.memory_space<vmem>>, vector<32x32xf32>
    tpu.vector_store %arg19[%c0_53, %c0_54], %113 {strides = array<i32>} : memref<32x32xf32, #tpu.memory_space<vmem>>, vector<32x32xf32>,
    %c0_55 = arith.constant 0 : index
    %c0_56 = arith.constant 0 : index
    %115 = vector.load %arg16[%c0_55, %c0_56] : memref<8x8xf32, #tpu.memory_space<vmem>>, vector<8x8xf32>
    %c0_57 = arith.constant 0 : index
    %c0_58 = arith.constant 0 : index
    %116 = vector.load %arg15[%c0_57, %c0_58] : memref<8x32xf32, #tpu.memory_space<vmem>>, vector<8x32xf32>
    %117 = arith.truncf %115 : vector<8x8xf32> to vector<8x8xbf16>
    %118 = arith.truncf %116 : vector<8x32xf32> to vector<8x32xbf16>
    %cst_59 = arith.constant dense<0.000000e+00> : vector<8x32xf32>
    %119 = tpu.matmul %117, %118, %cst_59 {dimension_numbers = #tpu.dot_dimension_numbers<[1], [0], [0], [1], [0, 0, 1, 1], [], []>} : vector<8x8xbf16>, vector<8x32xbf16>, vector<8x32xf32> -> vector<8x32xf32>
    %c0_60 = arith.constant 0 : index
    %c0_61 = arith.constant 0 : index
    %c0_62 = arith.constant 0 : index
    %120 = vector.load %arg17[%c0_60, %c0_61, %c0_62] : memref<1x32x32xf32, #tpu.memory_space<vmem>>, vector<1x32x32xf32>
    %121 = vector.shape_cast %120 : vector<1x32x32xf32> to vector<32x32xf32>
    %122 = arith.truncf %119 : vector<8x32xf32> to vector<8x32xbf16>
    %123 = arith.truncf %121 : vector<32x32xf32> to vector<32x32xbf16>
    %cst_63 = arith.constant dense<0.000000e+00> : vector<8x32xf32>
    %124 = tpu.matmul %122, %123, %cst_63 {dimension_numbers = #tpu.dot_dimension_numbers<[1], [0], [0], [1], [0, 0, 1, 1], [], []>} : vector<8x32xbf16>, vector<32x32xbf16>, vector<8x32xf32> -> vector<8x32xf32>
    %c0_64 = arith.constant 0 : index
    %c0_65 = arith.constant 0 : index
    %c0_66 = arith.constant 0 : index
    %125 = vector.load %arg18[%c0_64, %c0_65, %c0_66] : memref<1x1x32xf32, #tpu.memory_space<vmem>>, vector<1x1x32xf32>
    %126 = vector.shape_cast %125 : vector<1x1x32xf32> to vector<1x32xf32>
    %127 = vector.broadcast %126 : vector<1x32xf32> to vector<8x32xf32>
    %128 = arith.addf %124, %127 : vector<8x32xf32>
    %c0_67 = arith.constant 0 : index
    %c0_68 = arith.constant 0 : index
    %129 = vector.load %arg20[%c0_67, %c0_68] : memref<8x32xf32, #tpu.memory_space<vmem>>, vector<8x32xf32>
    tpu.vector_store %arg20[%c0_67, %c0_68], %128 {strides = array<i32>} : memref<8x32xf32, #tpu.memory_space<vmem>>, vector<8x32xf32>,
    return
  }
}

</mosaic_0001>

<bundles_post_ra>
// kernel: tpu_custom_call.1
= control target key start
LH: loop header
LB: loop body
LE: loop exit
PB: predicated region body
PF: predicated region fallthrough
CT: control target
= control target key end

     0   :  { %s1912_s0 = inlined_call_operand.hbm [shape: f32[32,32], index: 0, kind: input, shape index: {}]   ;;  %s1913_s1 = inlined_call_operand.hbm [shape: f32[1,32], index: 1, kind: input, shape index: {}]   ;;  %s1914_s2 = inlined_call_operand.hbm [shape: f32[1,32], index: 2, kind: input, shape index: {}]   ;;  %s1915_s3 = inlined_call_operand.hbm [shape: f32[32,32], index: 3, kind: input, shape index: {}]   ;;  %s1916_s4 = inlined_call_operand.hbm [shape: f32[16,16], index: 4, kind: input, shape index: {}]   ;;  %s1917_s5 = inlined_call_operand.hbm [shape: f32[1,32,32], index: 5, kind: input, shape index: {}]   ;;  %s1918_s6 = inlined_call_operand.hbm [shape: f32[1,1,32], index: 6, kind: input, shape index: {}]   ;;  %s1919_s7 = inlined_call_operand.hbm [shape: f32[32,32], index: 7, kind: input, shape index: {}]   ;;  %s1920_s8 = inlined_call_operand.hbm [shape: f32[1,32], index: 8, kind: input, shape index: {}]   ;;  %s1921_s9 = inlined_call_operand.hbm [shape: f32[1,32], index: 9, kind: input, shape index: {}]   ;;  %s1922_s10 = inlined_call_operand.hbm [shape: f32[1,32], index: 10, kind: input, shape index: {}]   ;;  %s1923_s11 = inlined_call_operand.vmem [shape: f32[32,32], index: 11, kind: input, shape index: {}]   ;;  %s1924_s12 = inlined_call_operand.hbm [shape: f32[1,32], index: 12, kind: input, shape index: {}]   ;;  %s1925_s13 = inlined_call_operand.hbm [shape: f32[1,32], index: 13, kind: input, shape index: {}]   ;;  %s1926_s14 = inlined_call_operand.hbm [shape: f32[1,32], index: 14, kind: input, shape index: {}]   ;;  %s1927_s15 = inlined_call_operand.hbm [shape: f32[8,32], index: 15, kind: input, shape index: {}]   ;;  %s1928_s16 = inlined_call_operand.hbm [shape: f32[8,8], index: 16, kind: input, shape index: {}]   ;;  %s1929_s17 = inlined_call_operand.vmem [shape: f32[1,32,32], index: 17, kind: input, shape index: {}]   ;;  %s1930_s18 = inlined_call_operand.vmem [shape: f32[1,1,32], index: 18, kind: input, shape index: {}]   ;;  %s1931_s19 = inlined_call_operand.hbm [shape: f32[32,32], index: 19, kind: output, shape index: {0}]   ;;  %s1932_s20 = inlined_call_operand.hbm [shape: f32[8,32], index: 20, kind: output, shape index: {1}]  }
   0x1   :  { %1939 = sst [smem:[#allocation42_spill]] %s1912_s0 }
   0x2   :  { %1940 = sst [smem:[#allocation43_spill]] %s1913_s1 }
   0x3   :  { %1941 = sst [smem:[#allocation44_spill]] %s1914_s2 }
   0x4   :  { %1942 = sst [smem:[#allocation45_spill]] %s1915_s3 }
   0x5   :  { %1943 = sst [smem:[#allocation46_spill]] %s1916_s4 }
   0x6   :  { %1944 = sst [smem:[#allocation47_spill]] %s1931_s19 }
   0x7   :  { %26 = vsyncpa [#allocation3], 0 }
   0x8   :  { %27 = vsyncpa [#allocation6], 0 }
   0x9   :  { %28 = vsyncpa [#allocation9], 0 }
   0xa   :  { %29 = vsyncpa [#allocation12], 0 }
   0xb   :  { %30 = vsyncpa [#allocation15], 0 }
   0xc   :  { %31 = vsyncpa [#allocation18], 0 }
   0xd   :  { %32 = vsyncpa [#allocation21], 0 }
   0xe   :  { %33 = vsyncpa [#allocation24], 0 }
   0xf   :  { %34 = vsyncpa [#allocation27], 0 }
  0x10   :  { %35 = vsyncpa [#allocation4], 0 }
  0x11   :  { %36 = vsyncpa [#allocation30], 0  ;;  %s1471_s1 = smov [#allocation5]   ;;  %s1945_s2 = sld [smem:[#allocation43_spill]] }
  0x12   :  { %s55_s22 = sshll.u32 %s1471_s1, 4  ;;  %s56_s22 = int_to_ptr.vmem [resolvable:$true] %s55_s22 }
  0x17   :  { %s1053_s25 = scalar_lea.hbm %s1945_s2, 16 }
  0x18   :  { %p1054_p0 = scmp.ne.s32.totalorder %s1945_s2, %s1053_s25  ;;  %p1057_p1 = scmp.lt.u32.totalorder %s1053_s25, %s1945_s2 }
  0x1a   :  { %p1059_p2 = pnand %p1057_p1, %p1054_p0 }
  0x1c   :  { %1062 = shalt.err (!%p1059_p2)
}
  0x1d   :  { %s1063_s4 = scalar_lea.vmem %s56_s22, 16  ;;  %s1067_s29 = scalar_lea.vmem %s56_s22, 32 }
  0x1e   :  { %p1064_p3 = scmp.ne.s32.totalorder %s56_s22, %s1063_s4  ;;  %p1068_p4 = scmp.lt.s32.totalorder %s56_s22, %s56_s22 }
  0x1f   :  { %p1069_p5 = scmp.lt.s32.totalorder %s1067_s29, %s1063_s4 }
  0x21   :  { %p1070_p6 = por %p1069_p5, %p1068_p4 }
  0x23   :  { %p1071_p7 = pnand %p1070_p6, %p1064_p3 }
  0x25   :  { %1074 = shalt.err (!%p1071_p7)
}
  0x26   :  { %58 = dma.hbm_to_vmem [thread:$0]  %s1945_s2, 16, %s56_s22, [#allocation6]  }
  0x27   :  { %s1472_s21 = smov [#allocation8]   ;;  %s1473_s23 = smov [#allocation11]  }
  0x28   :  { %s74_s1 = sshll.u32 %s1472_s21, 4  ;;  %s98_s24 = sshll.u32 %s1473_s23, 4  ;;  %s75_s1 = int_to_ptr.vmem [resolvable:$true] %s74_s1  ;;  %s99_s24 = int_to_ptr.vmem [resolvable:$true] %s98_s24 }
  0x29   :  { %s1946_s26 = sld [smem:[#allocation45_spill]] }
  0x2f   :  { %s1075_s27 = scalar_lea.hbm %s1946_s26, 512 }
  0x30   :  { %p1076_p8 = scmp.ne.s32.totalorder %s1946_s26, %s1075_s27  ;;  %p1079_p9 = scmp.lt.u32.totalorder %s1075_s27, %s1946_s26 }
  0x32   :  { %p1081_p10 = pnand %p1079_p9, %p1076_p8 }
  0x34   :  { %1084 = shalt.err (!%p1081_p10)
}
  0x35   :  { %s1085_s22 = scalar_lea.vmem %s75_s1, 512  ;;  %p1090_p12 = scmp.lt.s32.totalorder %s75_s1, %s75_s1 }
  0x36   :  { %p1086_p11 = scmp.ne.s32.totalorder %s75_s1, %s1085_s22  ;;  %p1091_p13 = scmp.lt.s32.totalorder %s1085_s22, %s1085_s22 }
  0x38   :  { %p1092_p0 = por %p1091_p13, %p1090_p12 }
  0x3a   :  { %p1093_p1 = pnand %p1092_p0, %p1086_p11 }
  0x3c   :  { %1096 = shalt.err (!%p1093_p1)
}
  0x3d   :  { %s1474_s2 = smov 128   ;;  %s1475_s30 = smov 8  }
  0x3e   :  { %80 = dma.hbm_to_vmem [thread:$0]  %s1946_s26, 512, %s75_s1, [#allocation9], %s1474_s2, %s1474_s2, %s1475_s30  }
  0x3f   :  { %s1097_s25 = scalar_lea.hbm %s1917_s5, 512 }
  0x40   :  { %p1098_p2 = scmp.ne.s32.totalorder %s1917_s5, %s1097_s25  ;;  %p1101_p3 = scmp.lt.u32.totalorder %s1097_s25, %s1917_s5 }
  0x42   :  { %p1103_p4 = pnand %p1101_p3, %p1098_p2 }
  0x44   :  { %1106 = shalt.err (!%p1103_p4)
}
  0x45   :  { %s1107_s29 = scalar_lea.vmem %s99_s24, 512  ;;  %p1112_p6 = scmp.lt.s32.totalorder %s99_s24, %s99_s24 }
  0x46   :  { %p1108_p5 = scmp.ne.s32.totalorder %s99_s24, %s1107_s29  ;;  %p1113_p7 = scmp.lt.s32.totalorder %s1107_s29, %s1107_s29 }
  0x48   :  { %p1114_p8 = por %p1113_p7, %p1112_p6 }
  0x4a   :  { %p1115_p9 = pnand %p1114_p8, %p1108_p5 }
  0x4c   :  { %1118 = shalt.err (!%p1115_p9)
}
  0x4d   :  { %104 = dma.hbm_to_vmem [thread:$0]  %s1917_s5, 512, %s99_s24, [#allocation12], %s1474_s2, %s1474_s2, %s1475_s30  }
  0x4e   :  { %s1476_s22 = smov [#allocation14]   ;;  %s1477_s0 = smov [#allocation17]  }
  0x4f   :  { %s120_s19 = sshll.u32 %s1476_s22, 4  ;;  %s143_s21 = sshll.u32 %s1477_s0, 4  ;;  %s121_s19 = int_to_ptr.vmem [resolvable:$true] %s120_s19  ;;  %s144_s21 = int_to_ptr.vmem [resolvable:$true] %s143_s21 }
  0x50   :  { %s1119_s3 = scalar_lea.hbm %s1919_s7, 512 }
  0x51   :  { %p1120_p10 = scmp.ne.s32.totalorder %s1919_s7, %s1119_s3  ;;  %p1123_p11 = scmp.lt.u32.totalorder %s1119_s3, %s1919_s7 }
  0x53   :  { %p1125_p12 = pnand %p1123_p11, %p1120_p10 }
  0x55   :  { %1128 = shalt.err (!%p1125_p12)
}
  0x56   :  { %s1129_s5 = scalar_lea.vmem %s121_s19, 512  ;;  %p1134_p0 = scmp.lt.s32.totalorder %s121_s19, %s121_s19 }
  0x57   :  { %p1130_p13 = scmp.ne.s32.totalorder %s121_s19, %s1129_s5  ;;  %p1135_p1 = scmp.lt.s32.totalorder %s1129_s5, %s1129_s5 }
  0x59   :  { %p1136_p2 = por %p1135_p1, %p1134_p0 }
  0x5b   :  { %p1137_p3 = pnand %p1136_p2, %p1130_p13 }
  0x5d   :  { %1140 = shalt.err (!%p1137_p3)
}
  0x5e   :  { %126 = dma.hbm_to_vmem [thread:$0]  %s1919_s7, 512, %s121_s19, [#allocation15], %s1474_s2, %s1474_s2, %s1475_s30  }
  0x5f   :  { %s1141_s0 = scalar_lea.hbm %s1921_s9, 16 }
  0x60   :  { %p1142_p4 = scmp.ne.s32.totalorder %s1921_s9, %s1141_s0  ;;  %p1145_p5 = scmp.lt.u32.totalorder %s1141_s0, %s1921_s9 }
  0x62   :  { %p1147_p6 = pnand %p1145_p5, %p1142_p4 }
  0x64   :  { %1150 = shalt.err (!%p1147_p6)
}
  0x65   :  { %s1151_s28 = scalar_lea.vmem %s144_s21, 16  ;;  %s1155_s4 = scalar_lea.vmem %s144_s21, 32 }
  0x66   :  { %p1152_p7 = scmp.ne.s32.totalorder %s144_s21, %s1151_s28  ;;  %p1156_p8 = scmp.lt.s32.totalorder %s144_s21, %s144_s21 }
  0x67   :  { %p1157_p9 = scmp.lt.s32.totalorder %s1155_s4, %s1151_s28 }
  0x69   :  { %p1158_p10 = por %p1157_p9, %p1156_p8 }
  0x6b   :  { %p1159_p11 = pnand %p1158_p10, %p1152_p7 }
  0x6d   :  { %1162 = shalt.err (!%p1159_p11)
}
  0x6e   :  { %146 = dma.hbm_to_vmem [thread:$0]  %s1921_s9, 16, %s144_s21, [#allocation18]  }
  0x6f   :  { %s1478_s29 = smov [#allocation20]   ;;  %s1479_s24 = smov [#allocation23]  }
  0x70   :  { %s165_s5 = sshll.u32 %s1478_s29, 4  ;;  %s185_s1 = sshll.u32 %s1479_s24, 4  ;;  %s166_s5 = int_to_ptr.vmem [resolvable:$true] %s165_s5  ;;  %s186_s1 = int_to_ptr.vmem [resolvable:$true] %s185_s1 }
  0x71   :  { %s1163_s0 = scalar_lea.hbm %s1924_s12, 16 }
  0x72   :  { %p1164_p12 = scmp.ne.s32.totalorder %s1924_s12, %s1163_s0  ;;  %p1167_p13 = scmp.lt.u32.totalorder %s1163_s0, %s1924_s12 }
  0x74   :  { %p1169_p0 = pnand %p1167_p13, %p1164_p12 }
  0x76   :  { %1172 = shalt.err (!%p1169_p0)
}
  0x77   :  { %s1173_s9 = scalar_lea.vmem %s166_s5, 16  ;;  %s1177_s21 = scalar_lea.vmem %s166_s5, 32 }
  0x78   :  { %p1174_p1 = scmp.ne.s32.totalorder %s166_s5, %s1173_s9  ;;  %p1178_p2 = scmp.lt.s32.totalorder %s166_s5, %s166_s5 }
  0x79   :  { %p1179_p3 = scmp.lt.s32.totalorder %s1177_s21, %s1173_s9 }
  0x7b   :  { %p1180_p4 = por %p1179_p3, %p1178_p2 }
  0x7d   :  { %p1181_p5 = pnand %p1180_p4, %p1174_p1 }
  0x7f   :  { %1184 = shalt.err (!%p1181_p5)
}
  0x80   :  { %168 = dma.hbm_to_vmem [thread:$0]  %s1924_s12, 16, %s166_s5, [#allocation21]  }
  0x81   :  { %s1185_s29 = scalar_lea.hbm %s1926_s14, 16 }
  0x82   :  { %p1186_p6 = scmp.ne.s32.totalorder %s1926_s14, %s1185_s29  ;;  %p1189_p7 = scmp.lt.u32.totalorder %s1185_s29, %s1926_s14 }
  0x84   :  { %p1191_p8 = pnand %p1189_p7, %p1186_p6 }
  0x86   :  { %1194 = shalt.err (!%p1191_p8)
}
  0x87   :  { %s1195_s23 = scalar_lea.vmem %s186_s1, 16  ;;  %s1199_s25 = scalar_lea.vmem %s186_s1, 32 }
  0x88   :  { %p1196_p9 = scmp.ne.s32.totalorder %s186_s1, %s1195_s23  ;;  %p1200_p10 = scmp.lt.s32.totalorder %s186_s1, %s186_s1 }
  0x89   :  { %p1201_p11 = scmp.lt.s32.totalorder %s1199_s25, %s1195_s23 }
  0x8b   :  { %p1202_p12 = por %p1201_p11, %p1200_p10 }
  0x8d   :  { %p1203_p13 = pnand %p1202_p12, %p1196_p9 }
  0x8f   :  { %1206 = shalt.err (!%p1203_p13)
}
  0x90   :  { %188 = dma.hbm_to_vmem [thread:$0]  %s1926_s14, 16, %s186_s1, [#allocation24]  }
  0x91   :  { %s1480_s3 = smov [#allocation2]   ;;  %s1481_s9 = smov [#allocation7]  }
  0x92   :  { %s42_s27 = sshll.u32 %s1480_s3, 4  ;;  %s65_s21 = sshll.u32 %s1481_s9, 4  ;;  %s43_s27 = int_to_ptr.vmem [resolvable:$true] %s42_s27  ;;  %s66_s21 = int_to_ptr.vmem [resolvable:$true] %s65_s21 }
  0x93   :  { %s1947_s7 = sld [smem:[#allocation42_spill]] }
  0x99   :  { %s1207_s19 = scalar_lea.hbm %s1947_s7, 512 }
  0x9a   :  { %p1208_p0 = scmp.ne.s32.totalorder %s1947_s7, %s1207_s19  ;;  %p1211_p1 = scmp.lt.u32.totalorder %s1207_s19, %s1947_s7 }
  0x9c   :  { %p1213_p2 = pnand %p1211_p1, %p1208_p0 }
  0x9e   :  { %1216 = shalt.err (!%p1213_p2)
}
  0x9f   :  { %s1217_s14 = scalar_lea.vmem %s43_s27, 512  ;;  %p1222_p4 = scmp.lt.s32.totalorder %s43_s27, %s43_s27 }
  0xa0   :  { %p1218_p3 = scmp.ne.s32.totalorder %s43_s27, %s1217_s14  ;;  %p1223_p5 = scmp.lt.s32.totalorder %s1217_s14, %s1217_s14 }
  0xa2   :  { %p1224_p6 = por %p1223_p5, %p1222_p4 }
  0xa4   :  { %p1225_p7 = pnand %p1224_p6, %p1218_p3 }
  0xa6   :  { %1228 = shalt.err (!%p1225_p7)
}
  0xa7   :  { %48 = dma.hbm_to_vmem [thread:$0]  %s1947_s7, 512, %s43_s27, [#allocation3], %s1474_s2, %s1474_s2, %s1475_s30  }
  0xa8   :  { %s1948_s12 = sld [smem:[#allocation44_spill]] }
  0xae   :  { %s1229_s5 = scalar_lea.hbm %s1948_s12, 16 }
  0xaf   :  { %p1230_p8 = scmp.ne.s32.totalorder %s1948_s12, %s1229_s5  ;;  %p1233_p9 = scmp.lt.u32.totalorder %s1229_s5, %s1948_s12 }
  0xb1   :  { %p1235_p10 = pnand %p1233_p9, %p1230_p8 }
  0xb3   :  { %1238 = shalt.err (!%p1235_p10)
}
  0xb4   :  { %s1239_s19 = scalar_lea.vmem %s66_s21, 16  ;;  %s1243_s29 = scalar_lea.vmem %s66_s21, 32 }
  0xb5   :  { %p1240_p11 = scmp.ne.s32.totalorder %s66_s21, %s1239_s19  ;;  %p1244_p12 = scmp.lt.s32.totalorder %s66_s21, %s66_s21 }
  0xb6   :  { %p1245_p13 = scmp.lt.s32.totalorder %s1243_s29, %s1239_s19 }
  0xb8   :  { %p1246_p0 = por %p1245_p13, %p1244_p12 }
  0xba   :  { %p1247_p1 = pnand %p1246_p0, %p1240_p11 }
  0xbc   :  { %1250 = shalt.err (!%p1247_p1)
}
  0xbd   :  { %68 = dma.hbm_to_vmem [thread:$0]  %s1948_s12, 16, %s66_s21, [#allocation6]  }
  0xbe   :  { %s1482_s24 = smov [#allocation10]   ;;  %s1483_s22 = smov [#allocation13]  }
  0xbf   :  { %s86_s26 = sshll.u32 %s1482_s24, 4  ;;  %s111_s14 = sshll.u32 %s1483_s22, 4  ;;  %s87_s26 = int_to_ptr.vmem [resolvable:$true] %s86_s26  ;;  %s112_s14 = int_to_ptr.vmem [resolvable:$true] %s111_s14 }
  0xc0   :  { %s1949_s23 = sld [smem:[#allocation46_spill]] }
  0xc6   :  { %s1251_s25 = scalar_lea.hbm %s1949_s23, 256 }
  0xc7   :  { %p1252_p2 = scmp.ne.s32.totalorder %s1949_s23, %s1251_s25  ;;  %p1255_p3 = scmp.lt.u32.totalorder %s1251_s25, %s1949_s23 }
  0xc9   :  { %p1257_p4 = pnand %p1255_p3, %p1252_p2 }
  0xcb   :  { %1260 = shalt.err (!%p1257_p4)
}
  0xcc   :  { %s1261_s21 = scalar_lea.vmem %s87_s26, 256  ;;  %p1266_p6 = scmp.lt.s32.totalorder %s87_s26, %s87_s26 }
  0xcd   :  { %p1262_p5 = scmp.ne.s32.totalorder %s87_s26, %s1261_s21  ;;  %p1267_p7 = scmp.lt.s32.totalorder %s1261_s21, %s1261_s21 }
  0xcf   :  { %p1268_p8 = por %p1267_p7, %p1266_p6 }
  0xd1   :  { %p1269_p9 = pnand %p1268_p8, %p1262_p5 }
  0xd3   :  { %1272 = shalt.err (!%p1269_p9)
}
  0xd4   :  { %92 = dma.hbm_to_vmem [thread:$0]  %s1949_s23, 256, %s87_s26, [#allocation9], %s1474_s2, %s1474_s2, %s1475_s30  }
  0xd5   :  { %s1273_s27 = scalar_lea.hbm %s1918_s6, 16 }
  0xd6   :  { %p1274_p10 = scmp.ne.s32.totalorder %s1918_s6, %s1273_s27  ;;  %p1277_p11 = scmp.lt.u32.totalorder %s1273_s27, %s1918_s6 }
  0xd8   :  { %p1279_p12 = pnand %p1277_p11, %p1274_p10 }
  0xda   :  { %1282 = shalt.err (!%p1279_p12)
}
  0xdb   :  { %s1283_s0 = scalar_lea.vmem %s112_s14, 16  ;;  %s1287_s25 = scalar_lea.vmem %s112_s14, 32 }
  0xdc   :  { %p1284_p13 = scmp.ne.s32.totalorder %s112_s14, %s1283_s0  ;;  %p1288_p0 = scmp.lt.s32.totalorder %s112_s14, %s112_s14 }
  0xdd   :  { %p1289_p1 = scmp.lt.s32.totalorder %s1287_s25, %s1283_s0 }
  0xdf   :  { %p1290_p2 = por %p1289_p1, %p1288_p0 }
  0xe1   :  { %p1291_p3 = pnand %p1290_p2, %p1284_p13 }
  0xe3   :  { %1294 = shalt.err (!%p1291_p3)
}
  0xe4   :  { %114 = dma.hbm_to_vmem [thread:$0]  %s1918_s6, 16, %s112_s14, [#allocation12]  }
  0xe5   :  { %s1484_s5 = smov [#allocation16]   ;;  %s1485_s9 = smov [#allocation19]  }
  0xe6   :  { %s133_s3 = sshll.u32 %s1484_s5, 4  ;;  %s153_s28 = sshll.u32 %s1485_s9, 4  ;;  %s134_s3 = int_to_ptr.vmem [resolvable:$true] %s133_s3  ;;  %s154_s28 = int_to_ptr.vmem [resolvable:$true] %s153_s28 }
  0xe7   :  { %s1295_s4 = scalar_lea.hbm %s1920_s8, 16 }
  0xe8   :  { %p1296_p4 = scmp.ne.s32.totalorder %s1920_s8, %s1295_s4  ;;  %p1299_p5 = scmp.lt.u32.totalorder %s1295_s4, %s1920_s8 }
  0xea   :  { %p1301_p6 = pnand %p1299_p5, %p1296_p4 }
  0xec   :  { %1304 = shalt.err (!%p1301_p6)
}
  0xed   :  { %s1305_s6 = scalar_lea.vmem %s134_s3, 16  ;;  %s1309_s14 = scalar_lea.vmem %s134_s3, 32 }
  0xee   :  { %p1306_p7 = scmp.ne.s32.totalorder %s134_s3, %s1305_s6  ;;  %p1310_p8 = scmp.lt.s32.totalorder %s134_s3, %s134_s3 }
  0xef   :  { %p1311_p9 = scmp.lt.s32.totalorder %s1309_s14, %s1305_s6 }
  0xf1   :  { %p1312_p10 = por %p1311_p9, %p1310_p8 }
  0xf3   :  { %p1313_p11 = pnand %p1312_p10, %p1306_p7 }
  0xf5   :  { %1316 = shalt.err (!%p1313_p11)
}
  0xf6   :  { %136 = dma.hbm_to_vmem [thread:$0]  %s1920_s8, 16, %s134_s3, [#allocation15]  }
  0xf7   :  { %s1317_s25 = scalar_lea.hbm %s1922_s10, 16 }
  0xf8   :  { %p1318_p12 = scmp.ne.s32.totalorder %s1922_s10, %s1317_s25  ;;  %p1321_p13 = scmp.lt.u32.totalorder %s1317_s25, %s1922_s10 }
  0xfa   :  { %p1323_p0 = pnand %p1321_p13, %p1318_p12 }
  0xfc   :  { %1326 = shalt.err (!%p1323_p0)
}
  0xfd   :  { %s1327_s21 = scalar_lea.vmem %s154_s28, 16  ;;  %s1331_s12 = scalar_lea.vmem %s154_s28, 32 }
  0xfe   :  { %p1328_p1 = scmp.ne.s32.totalorder %s154_s28, %s1327_s21  ;;  %p1332_p2 = scmp.lt.s32.totalorder %s154_s28, %s154_s28 }
  0xff   :  { %p1333_p3 = scmp.lt.s32.totalorder %s1331_s12, %s1327_s21 }
 0x101   :  { %p1334_p4 = por %p1333_p3, %p1332_p2 }
 0x103   :  { %p1335_p5 = pnand %p1334_p4, %p1328_p1 }
 0x105   :  { %1338 = shalt.err (!%p1335_p5)
}
 0x106   :  { %156 = dma.hbm_to_vmem [thread:$0]  %s1922_s10, 16, %s154_s28, [#allocation18]  }
 0x107   :  { %s1486_s4 = smov [#allocation22]   ;;  %s1487_s29 = smov [#allocation25]  }
 0x108   :  { %s175_s19 = sshll.u32 %s1486_s4, 4  ;;  %s195_s27 = sshll.u32 %s1487_s29, 4  ;;  %s176_s19 = int_to_ptr.vmem [resolvable:$true] %s175_s19  ;;  %s196_s27 = int_to_ptr.vmem [resolvable:$true] %s195_s27 }
 0x109   :  { %s1339_s14 = scalar_lea.hbm %s1925_s13, 16 }
 0x10a   :  { %p1340_p6 = scmp.ne.s32.totalorder %s1925_s13, %s1339_s14  ;;  %p1343_p7 = scmp.lt.u32.totalorder %s1339_s14, %s1925_s13 }
 0x10c   :  { %p1345_p8 = pnand %p1343_p7, %p1340_p6 }
 0x10e   :  { %1348 = shalt.err (!%p1345_p8)
}
 0x10f   :  { %s1349_s10 = scalar_lea.vmem %s176_s19, 16  ;;  %s1353_s28 = scalar_lea.vmem %s176_s19, 32 }
 0x110   :  { %p1350_p9 = scmp.ne.s32.totalorder %s176_s19, %s1349_s10  ;;  %p1354_p10 = scmp.lt.s32.totalorder %s176_s19, %s176_s19 }
 0x111   :  { %p1355_p11 = scmp.lt.s32.totalorder %s1353_s28, %s1349_s10 }
 0x113   :  { %p1356_p12 = por %p1355_p11, %p1354_p10 }
 0x115   :  { %p1357_p13 = pnand %p1356_p12, %p1350_p9 }
 0x117   :  { %1360 = shalt.err (!%p1357_p13)
}
 0x118   :  { %178 = dma.hbm_to_vmem [thread:$0]  %s1925_s13, 16, %s176_s19, [#allocation21]  }
 0x119   :  { %s1361_s9 = scalar_lea.hbm %s1927_s15, 128 }
 0x11a   :  { %p1362_p0 = scmp.ne.s32.totalorder %s1927_s15, %s1361_s9  ;;  %p1365_p1 = scmp.lt.u32.totalorder %s1361_s9, %s1927_s15 }
 0x11c   :  { %p1367_p2 = pnand %p1365_p1, %p1362_p0 }
 0x11e   :  { %1370 = shalt.err (!%p1367_p2)
}
 0x11f   :  { %s1371_s4 = scalar_lea.vmem %s196_s27, 128  ;;  %p1376_p4 = scmp.lt.s32.totalorder %s196_s27, %s196_s27 }
 0x120   :  { %p1372_p3 = scmp.ne.s32.totalorder %s196_s27, %s1371_s4  ;;  %p1377_p5 = scmp.lt.s32.totalorder %s1371_s4, %s1371_s4 }
 0x122   :  { %p1378_p6 = por %p1377_p5, %p1376_p4 }
 0x124   :  { %p1379_p7 = pnand %p1378_p6, %p1372_p3 }
 0x126   :  { %1382 = shalt.err (!%p1379_p7)
}
 0x127   :  { %198 = dma.hbm_to_vmem [thread:$0]  %s1927_s15, 128, %s196_s27, [#allocation24]  }
 0x128   :  { %s1488_s29 = smov [#allocation26]   ;;  %s1383_s24 = scalar_lea.hbm %s1928_s16, 128 }
 0x129   :  { %s205_s7 = sshll.u32 %s1488_s29, 4  ;;  %p1384_p8 = scmp.ne.s32.totalorder %s1928_s16, %s1383_s24  ;;  %s206_s7 = int_to_ptr.vmem [resolvable:$true] %s205_s7 }
 0x12a   :  { %p1387_p9 = scmp.lt.u32.totalorder %s1383_s24, %s1928_s16 }
 0x12c   :  { %p1389_p10 = pnand %p1387_p9, %p1384_p8 }
 0x12e   :  { %1392 = shalt.err (!%p1389_p10)
}
 0x12f   :  { %s1393_s28 = scalar_lea.vmem %s206_s7, 128  ;;  %p1398_p12 = scmp.lt.s32.totalorder %s206_s7, %s206_s7 }
 0x130   :  { %p1394_p11 = scmp.ne.s32.totalorder %s206_s7, %s1393_s28  ;;  %p1399_p13 = scmp.lt.s32.totalorder %s1393_s28, %s1393_s28 }
 0x132   :  { %p1400_p0 = por %p1399_p13, %p1398_p12 }
 0x134   :  { %p1401_p1 = pnand %p1400_p0, %p1394_p11 }
 0x136   :  { %1404 = shalt.err (!%p1401_p1)
}
 0x137   :  { %208 = dma.hbm_to_vmem [thread:$0]  %s1928_s16, 128, %s206_s7, [#allocation27]  }
 0x138   :  { %1449 = dma.done.wait [#allocation3], 512  }
 0x139   :  { %1450 = vsyncadd [#allocation3], 4294966784 }
 0x13a   :  { %1451 = dma.done.wait [#allocation6], 32  }
 0x13b   :  { %1452 = vsyncadd [#allocation6], 4294967264 }
 0x13c   :  { %1453 = dma.done.wait [#allocation9], 768  }
 0x13d   :  { %1454 = vsyncadd [#allocation9], 4294966528 }
 0x13e   :  { %1455 = dma.done.wait [#allocation12], 528  }
 0x13f   :  { %1456 = vsyncadd [#allocation12], 4294966768 }
 0x140   :  { %1457 = dma.done.wait [#allocation15], 528  }
 0x141   :  { %1458 = vsyncadd [#allocation15], 4294966768 }
 0x142   :  { %1459 = dma.done.wait [#allocation18], 32  }
 0x143   :  { %1460 = vsyncadd [#allocation18], 4294967264 }
 0x144   :  { %1461 = dma.done.wait [#allocation21], 32  }
 0x145   :  { %1462 = vsyncadd [#allocation21], 4294967264 }
 0x146   :  { %1463 = dma.done.wait [#allocation24], 144  }
 0x147   :  { %1464 = vsyncadd [#allocation24], 4294967152 }
 0x148   :  { %1465 = dma.done.wait [#allocation27], 128  }
 0x149   :  { %1466 = vsyncadd [#allocation27], 4294967168  ;;  %v1489_v0 = vmov 0.0   ;;  %vm1490_vm0 = vmmov 0   ;;  %v338_v1 = vld [vmem:[#allocation8] sm:$0xff]  ;;  %v339_v2 = vld [vmem:[#allocation8 + $0x8] sm:$0xff] }
 0x14a   :  { %975 = vmatprep.subr.bf16.mxu0 %v1489_v0  ;;  %981 = vmatprep.subr.bf16.mxu1 %v1489_v0  ;;  %v340_v3 = vld [vmem:[#allocation8 + $0x10] sm:$0xff]  ;;  %v343_v4 = vpack.c.bf16 %v339_v2, %v338_v1  ;;  %v341_v5 = vld [vmem:[#allocation8 + $0x18] sm:$0xff]  ;;  %v336_v6 = vld [vmem:[#allocation10] sm:$0xff]  ;;  %vm344_vm1 = vcmask 130048   ;;  %vm268_vm2 = vcmask 261120   ;;  %vm793_vm3 = vcmask 1043456  }
 0x14b   :  { %977 = vmatprep.mubr.msk.bf16.mxu0 %vm1490_vm0, %v1489_v0  ;;  %983 = vmatprep.mubr.msk.bf16.mxu1 %vm1490_vm0, %v1489_v0  ;;  %v337_v7 = vld [vmem:[#allocation10 + $0x8] sm:$0xff]  ;;  %v389_v8 = vpack.c.bf16 %v341_v5, %v340_v3  ;;  %v431_v10 = vld [vmem:[#allocation11] sm:$0xff]  ;;  %v432_v11 = vld [vmem:[#allocation11 + $0x8] sm:$0xff]  ;;  %vm789_vm4 = vcmask 64512   ;;  %s1491_s14 = smov [#allocation29]  }
 0x14c   :  { %v342_v9 = vpack.c.bf16 %v337_v7, %v336_v6  ;;  %976 = vmatpush3.bf16.msra.mxu0 %v343_v4  ;;  %v437_v12 = vpack.c.bf16 %v432_v11, %v431_v10  ;;  %v433_v13 = vld [vmem:[#allocation11 + $0x10] sm:$0xff]  ;;  %v434_v14 = vld [vmem:[#allocation11 + $0x18] sm:$0xff]  ;;  %v509_v26 = vld [vmem:[#allocation14] sm:$0xff]  ;;  %s913_s24 = sshll.u32 %s1491_s14, 4  ;;  %s914_s24 = int_to_ptr.vmem [resolvable:$true] %s913_s24 }
 0x14d   :  { %982 = vmatpush3.bf16.msra.mxu1 %v389_v8  ;;  %v438_v15 = vpack.c.bf16 %v434_v14, %v433_v13  ;;  %v510_v27 = vld [vmem:[#allocation14 + $0x8] sm:$0xff]  ;;  %v263_v30 = vld [vmem:[#allocation2 + $0x8] sm:$0xff]  ;;  %v264_v36 = vld [vmem:[#allocation2 + $0x10] sm:$0xff]  ;;  %s1405_s22 = scalar_lea.vmem %s914_s24, 128  ;;  %p1410_p3 = scmp.lt.s32.totalorder %s914_s24, %s914_s24 }
 0x14e   :  { %987 = vmatprep.subr.bf16.mxu0 %v437_v12  ;;  %v525_v28 = vpack.c.bf16 %v510_v27, %v509_v26  ;;  %v262_v29 = vld [vmem:[#allocation2] sm:$0xff]  ;;  %v512_v32 = vld [vmem:[#allocation14 + $0x18] sm:$0xff]  ;;  %v270_v34 = vsel %vm268_vm2, %v263_v30, 0.0  ;;  %v272_v38 = vsel %vm268_vm2, %v264_v36, 0.0  ;;  %v265_v39 = vld [vmem:[#allocation2 + $0x18] sm:$0xff]  ;;  %p1406_p2 = scmp.ne.s32.totalorder %s914_s24, %s1405_s22  ;;  %p1411_p4 = scmp.lt.s32.totalorder %s1405_s22, %s1405_s22 }
 0x14f   :  { %978 = vmatmul.mubr.msk.bf16.vlgmr.msra.gmra.mrb[0].mxu0 %vm344_vm1, %v342_v9  ;;  %v511_v31 = vld [vmem:[#allocation14 + $0x10] sm:$0xff]  ;;  %v269_v33 = vsel %vm268_vm2, %v262_v29, 0.0  ;;  %v274_v41 = vsel %vm268_vm2, %v265_v39, 0.0  ;;  %v934_v13 = vld [vmem:[#allocation5] ss:$0 sm:$0xff] }
 0x150   :  { %984 = vmatmul.mubr.msk.bf16.vlgmr.msra.gmra.mrb[0].mxu1 %vm344_vm1, %v342_v9  ;;  %988 = vmatpush3.bf16.msra.mxu0 %v437_v12  ;;  %v526_v35 = vpack.c.bf16 %v512_v32, %v511_v31  ;;  %v271_v37 = vadd.f32 %v270_v34, %v269_v33  ;;  %p1412_p5 = por %p1411_p4, %p1410_p3 }
 0x151   :  { %989 = vmatprep.subr.bf16.mxu0 %v438_v15  ;;  %995 = vmatprep.subr.bf16.mxu1 %v525_v28 }
 0x152   :  { %996 = vmatpush3.bf16.msra.mxu1 %v525_v28  ;;  %v273_v40 = vadd.f32 %v272_v38, %v271_v37  ;;  %p1413_p6 = pnand %p1412_p5, %p1406_p2 }
 0x153   :  { %997 = vmatprep.subr.bf16.mxu1 %v526_v35 }
 0x154   :  { %990 = vmatpush3.bf16.msra.mxu0 %v438_v15  ;;  %v275_v42 = vadd.f32 %v274_v41, %v273_v40  ;;  %v786_v40 = vld [vmem:[#allocation25] sm:$0xff] }
 0x156   :  { %998 = vmatpush3.bf16.msra.mxu1 %v526_v35  ;;  %v276_v43 = vrot.slane %v275_v42, 4 }
 0x157   :  { %1011 = vmatprep.subr.bf16.mxu1 %v1489_v0 }
 0x158   :  { %v277_v44 = vadd.f32 %v276_v43, %v275_v42 }
 0x15a   :  { %v278_v45 = vrot.slane %v277_v44, 2 }
 0x15c   :  { %v279_v46 = vadd.f32 %v278_v45, %v277_v44  ;;  %v788_v45 = vpack.c.bf16 %v786_v40, %v786_v40 }
 0x15e   :  { %v280_v47 = vrot.slane %v279_v46, 1 }
 0x160   :  { %v281_v48 = vadd.f32 %v280_v47, %v279_v46 }
 0x162   :  { %v283_v49 = vmul.f32 0.03125, %v281_v48 }
 0x164   :  { %v284_v50 = vsub.f32 %v262_v29, %v283_v49  ;;  %v285_v51 = vsub.f32 %v263_v30, %v283_v49  ;;  %v286_v52 = vsub.f32 %v264_v36, %v283_v49  ;;  %v287_v55 = vsub.f32 %v265_v39, %v283_v49 }
 0x166   :  { %v288_v53 = vmul.f32 %v284_v50, %v284_v50  ;;  %v289_v54 = vmul.f32 %v285_v51, %v285_v51  ;;  %v290_v56 = vmul.f32 %v286_v52, %v286_v52  ;;  %v291_v60 = vmul.f32 %v287_v55, %v287_v55 }
 0x168   :  { %v292_v57 = vsel %vm268_vm2, %v288_v53, 0.0  ;;  %v293_v58 = vsel %vm268_vm2, %v289_v54, 0.0  ;;  %v295_v61 = vsel %vm268_vm2, %v290_v56, 0.0  ;;  %v297_v63 = vsel %vm268_vm2, %v291_v60, 0.0  ;;  %v516_v53 = vld [vmem:[%s1923_s11] sm:$0xff]  ;;  %v517_v54 = vld [vmem:[%s1923_s11 + $0x8] sm:$0xff] }
 0x169   :  { %v294_v59 = vadd.f32 %v293_v58, %v292_v57  ;;  %v518_v56 = vld [vmem:[%s1923_s11 + $0x10] sm:$0xff]  ;;  %v519_v57 = vld [vmem:[%s1923_s11 + $0x18] sm:$0xff] }
 0x16a   :  { %v657_v58 = vpack.c.bf16 %v519_v57, %v518_v56 }
 0x16b   :  { %v296_v62 = vadd.f32 %v295_v61, %v294_v59  ;;  %v941_v59 = vld [vmem:[#allocation16] ss:$0 sm:$0xff] }
 0x16d   :  { %v298_v1 = vadd.f32 %v297_v63, %v296_v62 }
 0x16f   :  { %v299_v2 = vrot.slane %v298_v1, 4 }
 0x171   :  { %v300_v3 = vadd.f32 %v299_v2, %v298_v1 }
 0x173   :  { %v301_v4 = vrot.slane %v300_v3, 2 }
 0x175   :  { %v302_v5 = vadd.f32 %v301_v4, %v300_v3 }
 0x177   :  { %v303_v6 = vrot.slane %v302_v5, 1 }
 0x179   :  { %v304_v7 = vadd.f32 %v303_v6, %v302_v5 }
 0x17b   :  { %v305_v8 = vmul.f32 0.03125, %v304_v7 }
 0x17d   :  { %v306_v9 = vadd.f32 1e-05, %v305_v8 }
 0x17f   :  { %1047 = vrsqrt.f32 %v306_v9 }
 0x189   :  { %v1048_v10 = vpop.eup %1047 }
 0x18a   :  { %v310_v11 = vmul.f32 %v1048_v10, %v286_v52  ;;  %v311_v12 = vmul.f32 %v1048_v10, %v287_v55  ;;  %v308_v14 = vmul.f32 %v1048_v10, %v284_v50  ;;  %v309_v15 = vmul.f32 %v1048_v10, %v285_v51  ;;  %v785_v51 = vld [vmem:[#allocation26] sm:$0xff] }
 0x18b   :  { %v795_v50 = vsel %vm793_vm3, %v788_v45, 0  ;;  %v787_v52 = vpack.c.bf16 %v785_v51, %v785_v51  ;;  %v656_v55 = vpack.c.bf16 %v517_v54, %v516_v53 }
 0x18d   :  { %1003 = vmatprep.subr.bf16.mxu0 %v656_v55 }
 0x222   :  { %v382_v16 = vpop.f32.mrb[0].mxu0 }
 0x223   :  { %v424_v17 = vpop.f32.mrb[0].mxu1  ;;  %v979_v18 = vpop.f32.mrb[1].mxu0 }
 0x224   :  { %v985_v19 = vpop.f32.mrb[1].mxu1  ;;  %v385_v20 = vpop.f32.mrb[2].mxu0  ;;  %v935_v18 = vld [vmem:[#allocation7] ss:$0 sm:$0xff] }
 0x225   :  { %v435_v21 = vpack.c.bf16 %v385_v20, %v382_v16  ;;  %v427_v22 = vpop.f32.mrb[2].mxu1  ;;  %v980_v23 = vpop.f32.mrb[3].mxu0  ;;  %v320_v16 = vmul.f32 %v934_v13, %v310_v11  ;;  %v318_v19 = vmul.f32 %v934_v13, %v308_v14  ;;  %v319_v20 = vmul.f32 %v934_v13, %v309_v15 }
 0x226   :  { %v436_v24 = vpack.c.bf16 %v427_v22, %v424_v17  ;;  %v986_v25 = vpop.f32.mrb[3].mxu1  ;;  %v321_v17 = vmul.f32 %v934_v13, %v311_v12 }
 0x227   :  { %991 = vmatprep.mubr.msk.bf16.mxu0 %vm268_vm2, %v435_v21  ;;  %v938_v21 = vld [vmem:[#allocation13] ss:$0 sm:$0xff]  ;;  %v330_v22 = vadd.f32 %v935_v18, %v320_v16  ;;  %v328_v25 = vadd.f32 %v935_v18, %v318_v19  ;;  %v329_v26 = vadd.f32 %v935_v18, %v319_v20 }
 0x228   :  { %992 = vmatmul.mubr.msk.bf16.vlgmr.msra.gmra.mrb[4].mxu0 %vm268_vm2, %v436_v24  ;;  %v331_v23 = vadd.f32 %v935_v18, %v321_v17 }
 0x229   :  { %v334_v31 = vmax.f32 %v330_v22, 0.0  ;;  %v332_v36 = vmax.f32 %v328_v25, 0.0  ;;  %v333_v38 = vmax.f32 %v329_v26, 0.0  ;;  %1004 = vmatpush3.bf16.msra.mxu0 %v656_v55 }
 0x22a   :  { %v335_v33 = vmax.f32 %v331_v23, 0.0  ;;  %1005 = vmatprep.subr.bf16.mxu0 %v657_v58 }
 0x22d   :  { %1006 = vmatpush3.bf16.msra.mxu0 %v657_v58 }
 0x22e   :  { %1017 = vmatprep.subr.bf16.mxu0 %v1489_v0 }
 0x2fb   :  { %v993_v24 = vpop.f32.mrb[4].mxu0 }
 0x2fc   :  { %v495_v27 = vadd.f32 %v993_v24, %v938_v21  ;;  %v486_v28 = vpop.f32.mrb[5].mxu0 }
 0x2fd   :  { %v487_v29 = vadd.f32 %v938_v21, %v486_v28  ;;  %v994_v30 = vpop.f32.mrb[6].mxu0 }
 0x2fe   :  { %v503_v32 = vmul.f32 0.2, %v495_v27  ;;  %v498_v34 = vadd.f32 %v994_v30, %v938_v21  ;;  %v489_v35 = vpop.f32.mrb[7].mxu0 }
 0x2ff   :  { %v501_v37 = vmul.f32 0.2, %v487_v29  ;;  %v490_v39 = vadd.f32 %v938_v21, %v489_v35 }
 0x300   :  { %v504_v41 = vmul.f32 0.2, %v498_v34  ;;  %v507_v43 = vadd.f32 %v503_v32, %v334_v31 }
 0x301   :  { %v502_v42 = vmul.f32 0.2, %v490_v39  ;;  %v505_v46 = vadd.f32 %v501_v37, %v332_v36 }
 0x302   :  { %v508_v44 = vadd.f32 %v504_v41, %v335_v33 }
 0x303   :  { %v506_v47 = vadd.f32 %v502_v42, %v333_v38 }
 0x304   :  { %v524_v48 = vpack.c.bf16 %v508_v44, %v507_v43 }
 0x305   :  { %v523_v49 = vpack.c.bf16 %v506_v47, %v505_v46  ;;  %v944_v47 = vld [vmem:[#allocation17] ss:$0 sm:$0xff] }
 0x307   :  { %999 = vmatprep.mubr.msk.bf16.mxu1 %vm268_vm2, %v523_v49 }
 0x308   :  { %1000 = vmatmul.mubr.msk.bf16.vlgmr.msra.gmra.mrb[4].mxu1 %vm268_vm2, %v524_v48 }
 0x309   :  { %1012 = vmatpush3.bf16.msra.mxu1 %v795_v50  ;;  %1013 = vmatprep.mubr.msk.bf16.mxu1 %vm1490_vm0, %v1489_v0 }
 0x310   :  { %1014 = vmatmul.mubr.msk.bf16.vlgmr.msra.gmra.mrb[8].mxu1 %vm789_vm4, %v787_v52  ;;  %v945_v52 = vld [vmem:[#allocation19] ss:$0 sm:$0xff] }
 0x3db   :  { %v1001_v60 = vpop.f32.mrb[4].mxu1 }
 0x3dc   :  { %v573_v61 = vpop.f32.mrb[5].mxu1  ;;  %v582_v2 = vadd.f32 %v1001_v60, %v941_v59 }
 0x3dd   :  { %v574_v62 = vadd.f32 %v941_v59, %v573_v61  ;;  %v1002_v63 = vpop.f32.mrb[6].mxu1  ;;  %v837_v61 = vld [vmem:[%s1929_s17] sm:$0xff] }
 0x3de   :  { %v576_v1 = vpop.f32.mrb[7].mxu1  ;;  %v585_v5 = vadd.f32 %v1002_v63, %v941_v59  ;;  %v591_v8 = vsel %vm268_vm2, %v582_v2, 0.0 }
 0x3df   :  { %v577_v3 = vadd.f32 %v941_v59, %v576_v1  ;;  %v588_v4 = vsel %vm268_vm2, %v574_v62, 0.0 }
 0x3e0   :  { %v593_v12 = vsel %vm268_vm2, %v585_v5, 0.0 }
 0x3e1   :  { %v589_v6 = vsel %vm268_vm2, %v577_v3, 0.0 }
 0x3e2   :  { %v590_v7 = vadd.f32 %v589_v6, %v588_v4 }
 0x3e3   :  { %v1842_v9 = vpop.f32.mrb[8].mxu1 }
 0x3e4   :  { %v592_v10 = vadd.f32 %v591_v8, %v590_v7  ;;  %v1015_v11 = vpop.f32.mrb[9].mxu1  ;;  %v839_v7 = vld [vmem:[%s1929_s17 + $0x10] sm:$0xff]  ;;  %v840_v8 = vld [vmem:[%s1929_s17 + $0x18] sm:$0xff] }
 0x3e5   :  { %v834_v13 = vpop.f32.mrb[10].mxu1  ;;  %v841_v11 = vpack.c.bf16 %v1842_v9, %v1842_v9 }
 0x3e6   :  { %v594_v14 = vadd.f32 %v593_v12, %v592_v10  ;;  %v1016_v15 = vpop.f32.mrb[11].mxu1  ;;  %v843_v10 = vpack.c.bf16 %v840_v8, %v839_v7  ;;  %v946_v12 = vld [vmem:[#allocation20] ss:$0 sm:$0xff] }
 0x3e8   :  { %v595_v16 = vrot.slane %v594_v14, 4 }
 0x3ea   :  { %v596_v17 = vadd.f32 %v595_v16, %v594_v14 }
 0x3ec   :  { %v597_v18 = vrot.slane %v596_v17, 2 }
 0x3ee   :  { %v598_v19 = vadd.f32 %v597_v18, %v596_v17 }
 0x3f0   :  { %v599_v20 = vrot.slane %v598_v19, 1 }
 0x3f2   :  { %v600_v21 = vadd.f32 %v599_v20, %v598_v19 }
 0x3f4   :  { %v601_v22 = vmul.f32 0.03125, %v600_v21 }
 0x3f6   :  { %v602_v23 = vsub.f32 %v574_v62, %v601_v22  ;;  %v603_v24 = vsub.f32 %v577_v3, %v601_v22  ;;  %v604_v25 = vsub.f32 %v582_v2, %v601_v22  ;;  %v605_v26 = vsub.f32 %v585_v5, %v601_v22  ;;  %v838_v62 = vld [vmem:[%s1929_s17 + $0x8] sm:$0xff] }
 0x3f7   :  { %v842_v6 = vpack.c.bf16 %v838_v62, %v837_v61 }
 0x3f8   :  { %v606_v27 = vmul.f32 %v602_v23, %v602_v23  ;;  %v607_v28 = vmul.f32 %v603_v24, %v603_v24  ;;  %v608_v29 = vmul.f32 %v604_v25, %v604_v25  ;;  %v609_v30 = vmul.f32 %v605_v26, %v605_v26 }
 0x3fa   :  { %v610_v31 = vsel %vm268_vm2, %v606_v27, 0.0  ;;  %v611_v32 = vsel %vm268_vm2, %v607_v28, 0.0  ;;  %v613_v34 = vsel %vm268_vm2, %v608_v29, 0.0  ;;  %v615_v36 = vsel %vm268_vm2, %v609_v30, 0.0 }
 0x3fb   :  { %v612_v33 = vadd.f32 %v611_v32, %v610_v31 }
 0x3fd   :  { %v614_v35 = vadd.f32 %v613_v34, %v612_v33 }
 0x3ff   :  { %v616_v37 = vadd.f32 %v615_v36, %v614_v35 }
 0x401   :  { %v617_v38 = vrot.slane %v616_v37, 4 }
 0x403   :  { %v618_v39 = vadd.f32 %v617_v38, %v616_v37 }
 0x405   :  { %v619_v40 = vrot.slane %v618_v39, 2 }
 0x407   :  { %v620_v41 = vadd.f32 %v619_v40, %v618_v39 }
 0x409   :  { %v621_v42 = vrot.slane %v620_v41, 1 }
 0x40b   :  { %v622_v43 = vadd.f32 %v621_v42, %v620_v41 }
 0x40d   :  { %v623_v44 = vmul.f32 0.03125, %v622_v43 }
 0x40f   :  { %v624_v45 = vadd.f32 1e-05, %v623_v44 }
 0x411   :  { %1049 = vrsqrt.f32 %v624_v45 }
 0x41b   :  { %v1050_v46 = vpop.eup %1049 }
 0x41c   :  { %v627_v48 = vmul.f32 %v1050_v46, %v603_v24  ;;  %v628_v49 = vmul.f32 %v1050_v46, %v604_v25  ;;  %v629_v50 = vmul.f32 %v1050_v46, %v605_v26  ;;  %v626_v51 = vmul.f32 %v1050_v46, %v602_v23 }
 0x41e   :  { %v637_v53 = vmul.f32 %v944_v47, %v627_v48  ;;  %v638_v54 = vmul.f32 %v944_v47, %v628_v49  ;;  %v639_v55 = vmul.f32 %v944_v47, %v629_v50  ;;  %v636_v56 = vmul.f32 %v944_v47, %v626_v51 }
 0x420   :  { %v647_v57 = vadd.f32 %v945_v52, %v637_v53  ;;  %v646_v58 = vadd.f32 %v945_v52, %v636_v56  ;;  %v648_v59 = vadd.f32 %v945_v52, %v638_v54  ;;  %v649_v60 = vadd.f32 %v945_v52, %v639_v55 }
 0x422   :  { %v651_v63 = vmax.f32 %v647_v57, 0.0  ;;  %v650_v1 = vmax.f32 %v646_v58, 0.0  ;;  %v652_v2 = vmax.f32 %v648_v59, 0.0  ;;  %v653_v3 = vmax.f32 %v649_v60, 0.0 }
 0x424   :  { %v654_v4 = vpack.c.bf16 %v651_v63, %v650_v1  ;;  %v655_v5 = vpack.c.bf16 %v653_v3, %v652_v2 }
 0x426   :  { %1007 = vmatprep.mubr.msk.bf16.mxu0 %vm268_vm2, %v654_v4 }
 0x427   :  { %1008 = vmatmul.mubr.msk.bf16.vlgmr.msra.gmra.mrb[8].mxu0 %vm268_vm2, %v655_v5 }
 0x428   :  { %1018 = vmatpush3.bf16.msra.mxu0 %v842_v6  ;;  %1021 = vmatprep.mubr.msk.bf16.mxu0 %vm1490_vm0, %v1489_v0 }
 0x429   :  { %1019 = vmatprep.subr.bf16.mxu0 %v1489_v0  ;;  %v952_v0 = vld [vmem:[%s1930_s18] ss:$0 sm:$0xff] }
 0x42c   :  { %1020 = vmatpush3.bf16.msra.mxu0 %v843_v10 }
 0x42f   :  { %1022 = vmatmul.mubr.msk.bf16.vlgmr.msra.gmra.mrb[12].mxu0 %vm268_vm2, %v841_v11 }
 0x4fa   :  { %v1009_v13 = vpop.f32.mrb[8].mxu0 }
 0x4fb   :  { %v704_v14 = vpop.f32.mrb[9].mxu0  ;;  %v713_v18 = vadd.f32 %v1009_v13, %v946_v12 }
 0x4fc   :  { %v705_v15 = vadd.f32 %v946_v12, %v704_v14  ;;  %v1010_v16 = vpop.f32.mrb[10].mxu0 }
 0x4fd   :  { %v707_v17 = vpop.f32.mrb[11].mxu0  ;;  %v716_v21 = vadd.f32 %v1010_v16, %v946_v12  ;;  %v722_v23 = vsel %vm268_vm2, %v713_v18, 0.0 }
 0x4fe   :  { %v708_v19 = vadd.f32 %v946_v12, %v707_v17  ;;  %v719_v20 = vsel %vm268_vm2, %v705_v15, 0.0 }
 0x4ff   :  { %v724_v28 = vsel %vm268_vm2, %v716_v21, 0.0 }
 0x500   :  { %v720_v22 = vsel %vm268_vm2, %v708_v19, 0.0 }
 0x501   :  { %v721_v9 = vadd.f32 %v720_v22, %v719_v20 }
 0x502   :  { %v888_v24 = vpop.f32.mrb[12].mxu0 }
 0x503   :  { %v723_v25 = vadd.f32 %v722_v23, %v721_v9  ;;  %v889_v26 = vadd.f32 %v952_v0, %v888_v24  ;;  %v1023_v27 = vpop.f32.mrb[13].mxu0 }
 0x504   :  { %v891_v29 = vpop.f32.mrb[14].mxu0 }
 0x505   :  { %v725_v30 = vadd.f32 %v724_v28, %v723_v25  ;;  %894 = vst.msk [vmem:[#allocation29] sm:$0xff] %vm268_vm2, %v889_v26  ;;  %v1024_v31 = vpop.f32.mrb[15].mxu0 }
 0x506   :  { %1416 = shalt.err (!%p1413_p6)
}
 0x507   :  { %s1417_s0 = scalar_lea.hbm %s1932_s20, 128 }
 0x508   :  { %p1418_p7 = scmp.ne.s32.totalorder %s1932_s20, %s1417_s0  ;;  %p1421_p8 = scmp.lt.u32.totalorder %s1417_s0, %s1932_s20 }
 0x50a   :  { %p1423_p9 = pnand %p1421_p8, %p1418_p7 }
 0x50c   :  { %1426 = shalt.err (!%p1423_p9)
}
 0x50d   :  { %916 = dma.vmem_to_hbm [thread:$0]  %s914_s24, 128, %s1932_s20, [#allocation30]   ;;  %v726_v32 = vrot.slane %v725_v30, 4  ;;  %v949_v63 = vld [vmem:[#allocation22] ss:$0 sm:$0xff] }
 0x50e   :  { %v950_v5 = vld [vmem:[#allocation23] ss:$0 sm:$0xff]  ;;  %s1492_s20 = smov [#allocation28]  }
 0x50f   :  { %v727_v33 = vadd.f32 %v726_v32, %v725_v30  ;;  %s900_s26 = sshll.u32 %s1492_s20, 4  ;;  %s901_s26 = int_to_ptr.vmem [resolvable:$true] %s900_s26 }
 0x510   :  { %s1427_s23 = scalar_lea.vmem %s901_s26, 512  ;;  %p1432_p11 = scmp.lt.s32.totalorder %s901_s26, %s901_s26 }
 0x511   :  { %v728_v34 = vrot.slane %v727_v33, 2  ;;  %p1428_p10 = scmp.ne.s32.totalorder %s901_s26, %s1427_s23  ;;  %p1433_p12 = scmp.lt.s32.totalorder %s1427_s23, %s1427_s23 }
 0x513   :  { %v729_v35 = vadd.f32 %v728_v34, %v727_v33  ;;  %p1434_p13 = por %p1433_p12, %p1432_p11 }
 0x515   :  { %v730_v36 = vrot.slane %v729_v35, 1  ;;  %p1435_p0 = pnand %p1434_p13, %p1428_p10 }
 0x517   :  { %v731_v37 = vadd.f32 %v730_v36, %v729_v35 }
 0x519   :  { %v732_v38 = vmul.f32 0.03125, %v731_v37 }
 0x51b   :  { %v733_v39 = vsub.f32 %v705_v15, %v732_v38  ;;  %v734_v40 = vsub.f32 %v708_v19, %v732_v38  ;;  %v735_v41 = vsub.f32 %v713_v18, %v732_v38  ;;  %v736_v42 = vsub.f32 %v716_v21, %v732_v38 }
 0x51d   :  { %v737_v43 = vmul.f32 %v733_v39, %v733_v39  ;;  %v738_v44 = vmul.f32 %v734_v40, %v734_v40  ;;  %v739_v45 = vmul.f32 %v735_v41, %v735_v41  ;;  %v740_v46 = vmul.f32 %v736_v42, %v736_v42 }
 0x51f   :  { %v741_v47 = vsel %vm268_vm2, %v737_v43, 0.0  ;;  %v742_v48 = vsel %vm268_vm2, %v738_v44, 0.0  ;;  %v744_v50 = vsel %vm268_vm2, %v739_v45, 0.0  ;;  %v746_v52 = vsel %vm268_vm2, %v740_v46, 0.0 }
 0x520   :  { %v743_v49 = vadd.f32 %v742_v48, %v741_v47 }
 0x522   :  { %v745_v51 = vadd.f32 %v744_v50, %v743_v49 }
 0x524   :  { %v747_v53 = vadd.f32 %v746_v52, %v745_v51 }
 0x526   :  { %v748_v54 = vrot.slane %v747_v53, 4 }
 0x528   :  { %v749_v55 = vadd.f32 %v748_v54, %v747_v53 }
 0x52a   :  { %v750_v56 = vrot.slane %v749_v55, 2 }
 0x52c   :  { %v751_v57 = vadd.f32 %v750_v56, %v749_v55 }
 0x52e   :  { %v752_v58 = vrot.slane %v751_v57, 1 }
 0x530   :  { %v753_v59 = vadd.f32 %v752_v58, %v751_v57 }
 0x532   :  { %v754_v60 = vmul.f32 0.03125, %v753_v59 }
 0x534   :  { %v755_v61 = vadd.f32 1e-05, %v754_v60 }
 0x536   :  { %1051 = vrsqrt.f32 %v755_v61 }
 0x540   :  { %v1052_v62 = vpop.eup %1051 }
 0x541   :  { %v757_v1 = vmul.f32 %v1052_v62, %v733_v39  ;;  %v758_v2 = vmul.f32 %v1052_v62, %v734_v40  ;;  %v759_v3 = vmul.f32 %v1052_v62, %v735_v41  ;;  %v760_v4 = vmul.f32 %v1052_v62, %v736_v42 }
 0x543   :  { %v767_v6 = vmul.f32 %v949_v63, %v757_v1  ;;  %v768_v7 = vmul.f32 %v949_v63, %v758_v2  ;;  %v769_v8 = vmul.f32 %v949_v63, %v759_v3  ;;  %v770_v10 = vmul.f32 %v949_v63, %v760_v4 }
 0x545   :  { %v778_v11 = vadd.f32 %v950_v5, %v768_v7  ;;  %v777_v12 = vadd.f32 %v950_v5, %v767_v6  ;;  %v779_v13 = vadd.f32 %v950_v5, %v769_v8  ;;  %v780_v14 = vadd.f32 %v950_v5, %v770_v10 }
 0x547   :  { %782 = vst.msk [vmem:[#allocation28 + $0x8] sm:$0xff] %vm268_vm2, %v778_v11  ;;  %781 = vst.msk [vmem:[#allocation28] sm:$0xff] %vm268_vm2, %v777_v12 }
 0x548   :  { %783 = vst.msk [vmem:[#allocation28 + $0x10] sm:$0xff] %vm268_vm2, %v779_v13  ;;  %784 = vst.msk [vmem:[#allocation28 + $0x18] sm:$0xff] %vm268_vm2, %v780_v14 }
 0x549   :  { %1438 = shalt.err (!%p1435_p0)
}
 0x54a   :  { %s1950_s21 = sld [smem:[#allocation47_spill]] }
 0x550   :  { %s1439_s12 = scalar_lea.hbm %s1950_s21, 512 }
 0x551   :  { %p1440_p1 = scmp.ne.s32.totalorder %s1950_s21, %s1439_s12  ;;  %p1443_p2 = scmp.lt.u32.totalorder %s1439_s12, %s1950_s21 }
 0x553   :  { %p1445_p3 = pnand %p1443_p2, %p1440_p1 }
 0x555   :  { %1448 = shalt.err (!%p1445_p3)
}
 0x556   :  { %906 = dma.vmem_to_hbm [thread:$0]  %s901_s26, 512, %s1950_s21, [#allocation4], %s1474_s2, %s1474_s2, %s1475_s30  }
 0x557   :  { %1467 = dma.done.wait [#allocation4], 512  }
 0x558   :  { %1468 = vsyncadd [#allocation4], 4294966784 }
 0x559   :  { %1469 = dma.done.wait [#allocation30], 128  }
 0x55a   :  { %1470 = vsyncadd [#allocation30], 4294967168 }
 0x55b   :  { %923 = vsyncpa [#allocation3], 1 }
 0x55c   :  { %924 = vsyncpa [#allocation6], 1 }
 0x55d   :  { %925 = vsyncpa [#allocation9], 1 }
 0x55e   :  { %926 = vsyncpa [#allocation12], 1 }
 0x55f   :  { %927 = vsyncpa [#allocation15], 1 }
 0x560   :  { %928 = vsyncpa [#allocation18], 1 }
 0x561   :  { %929 = vsyncpa [#allocation21], 1 }
 0x562   :  { %930 = vsyncpa [#allocation24], 1 }
 0x563   :  { %931 = vsyncpa [#allocation27], 1 }
 0x564   :  { %932 = vsyncpa [#allocation4], 1 }
 0x565   :  { %933 = vsyncpa [#allocation30], 1 }

</bundles_post_ra>
